<compile_context>
chip_gen: v7x
topology: tpu7x:2x2x1
jax: 0.10.0
libtpu: 0.0.40
codegen_flags: <defaults>
</compile_context>

<pallas_src>
import functools
import numpy as np
import jax
import jax.numpy as jnp
from jax import lax
from jax.experimental import pallas as pl
from jax.experimental.pallas import tpu as pltpu

EPS = 1e-5  # nn.InstanceNorm3d default eps


def _round_up(a, m):
    return (a + m - 1) // m * m


# ---------------------------------------------------------------------------
# Kernel A: fused, reparameterised 3x3x3 conv (27 shifted-window GEMMs) with
# manual double-buffered halo DMA + per-sample per-channel sum / sum_sq stats.
# ---------------------------------------------------------------------------
def _repvgg_conv_kernel(mask_ref, x_hbm, w_ref, z_ref, stats_ref, xwin, sem,
                        *, tap_offsets, tn, win):
    b = pl.program_id(0)
    t = pl.program_id(1)
    n_tiles = pl.num_programs(1)
    slot = t % 2

    def start_fetch(tile_idx, sl):
        start = pl.multiple_of(tile_idx * tn, 128)
        pltpu.make_async_copy(
            x_hbm.at[b, :, pl.ds(start, win)],
            xwin.at[sl],
            sem.at[sl],
        ).start()

    # first tile of each sample: fetch synchronously (prefetch never crosses the
    # 'parallel' batch axis, so megacore sharding on b stays safe).
    @pl.when(t == 0)
    def _():
        start_fetch(t, slot)

    # prefetch next tile of the same sample while we compute this one.
    @pl.when(t + 1 < n_tiles)
    def _():
        start_fetch(t + 1, 1 - slot)

    pltpu.make_async_copy(
        x_hbm.at[b, :, pl.ds(0, win)], xwin.at[slot], sem.at[slot]
    ).wait()

    window = xwin[slot]                       # (Cin, WIN) bf16 halo window
    cout = w_ref.shape[1]
    acc = jnp.zeros((cout, tn), jnp.float32)
    for k, off in enumerate(tap_offsets):     # 27 unrolled MXU GEMMs, f32 accumulation
        xk = window[:, off:off + tn]          # (Cin, TN) shifted view of the window
        acc += jnp.dot(w_ref[k], xk, preferred_element_type=jnp.float32)

    z_ref[...] = acc                          # lane-dense (Cout, TN) f32 tile

    # masked partial InstanceNorm statistics (valid voxels only)
    m = mask_ref[...]                         # (1, TN)
    zm = acc * m
    s = jnp.sum(zm, axis=1, keepdims=True)    # (Cout, 1)
    ss = jnp.sum(zm * acc, axis=1, keepdims=True)

    @pl.when(t == 0)
    def _():
        stats_ref[...] = jnp.zeros_like(stats_ref)
    stats_ref[...] += jnp.concatenate([s, ss], axis=1)


# ---------------------------------------------------------------------------
# Kernel B: second pass -> (z - mean) * rsqrt(var + eps), SiLU, validity mask.
# ---------------------------------------------------------------------------
def _norm_silu_kernel(z_ref, mean_ref, inv_ref, mask_ref, y_ref):
    zh = (z_ref[...] - mean_ref[...]) * inv_ref[...]
    y = zh * jax.nn.sigmoid(zh)
    y_ref[...] = (y * mask_ref[...]).astype(y_ref.dtype)


# ---------------------------------------------------------------------------
# Downsample3D: Conv3d(k=3, s=2, p=1, bias=True) as a tiled lane-dense GEMM.
# ---------------------------------------------------------------------------
def _down_kernel(p_ref, w_ref, b_ref, o_ref):
    acc = jnp.dot(w_ref[...], p_ref[...], preferred_element_type=jnp.float32)
    o_ref[...] = acc + b_ref[...]


def _downsample3d(x, w, bias, *, tile_n=256):
    B, Cin, D0, H0, W0 = x.shape
    Cout = w.shape[0]
    Do = (D0 - 1) // 2 + 1
    Ho = (H0 - 1) // 2 + 1
    Wo = (W0 - 1) // 2 + 1
    # TODO(synk): the stride-2 conv still builds a small (~3.4x) JAX-side patch tensor;
    # stride-2 lane gathers are not expressed in-kernel (the stride-1 block convs,
    # which dominate the stage, are fully im2col-free).
    xp = jnp.pad(x.astype(jnp.bfloat16), ((0, 0), (0, 0), (1, 1), (1, 1), (1, 1)))
    taps = [xp[:, :, kd:kd + 2 * Do:2, kh:kh + 2 * Ho:2, kw:kw + 2 * Wo:2]
            for kd in range(3) for kh in range(3) for kw in range(3)]
    p = jnp.stack(taps, axis=1).reshape(B, 27 * Cin, Do * Ho * Wo)

    K = 27 * Cin
    N = Do * Ho * Wo
    TN = min(tile_n, _round_up(N, 128))
    Np = _round_up(N, TN)
    p = jnp.pad(p, ((0, 0), (0, 0), (0, Np - N)))

    out = pl.pallas_call(
        _down_kernel,
        grid=(B, Np // TN),
        in_specs=[
            pl.BlockSpec((None, K, TN), lambda b, t: (b, 0, t)),
            pl.BlockSpec((Cout, K), lambda b, t: (0, 0)),
            pl.BlockSpec((Cout, 1), lambda b, t: (0, 0)),
        ],
        out_specs=pl.BlockSpec((None, Cout, TN), lambda b, t: (b, 0, t)),
        out_shape=jax.ShapeDtypeStruct((B, Cout, Np), jnp.float32),
        compiler_params=pltpu.CompilerParams(
            dimension_semantics=("parallel", "parallel"),
            vmem_limit_bytes=48 * 1024 * 1024),
        cost_estimate=pl.CostEstimate(
            flops=2 * B * Np * K * Cout, transcendentals=0,
            bytes_accessed=2 * B * Np * K + 4 * B * Np * Cout),
    )(p, w.astype(jnp.bfloat16), bias.reshape(Cout, 1).astype(jnp.float32))
    return out[:, :, :N].reshape(B, Cout, Do, Ho, Wo)


# ---------------------------------------------------------------------------
# Full stage: x (NCDHW) -> Downsample3D -> [RepVGGBlock3D(reparam)] * num_blocks
# ---------------------------------------------------------------------------
def unet3d_encoder_stage(x, params, *, tile_n=512):
    # tile_n: spatial tile (lane dim). 512 fits the small test; for production shapes
    # raise to ~2048-8192 on v5e/v6e (128 MiB VMEM) and ~1024-4096 on v7x (64 MiB).
    B = x.shape[0]
    Cout = params["down_w"].shape[0]

    y0 = _downsample3d(x, params["down_w"], params["down_b"])
    if not params["blocks"]:
        return y0

    _, _, D, H, W = y0.shape
    Dp, Hp, Wp = D + 2, H + 2, W + 2
    HpWp = Hp * Wp
    TN = min(tile_n, _round_up(D * HpWp, 128))
    NOUT = _round_up(D * HpWp, TN)             # flat "base" positions computed per sample
    n_tiles = NOUT // TN
    halo = _round_up(2 * HpWp + 2 * Wp + 2, 128)   # max tap offset, lane aligned
    WIN = TN + halo                                 # DMA window per tile
    NTOT = NOUT + halo                              # padded flat input length
    SHIFT = HpWp + Wp + 1                           # (d,h,w) -> (d+1,h+1,w+1) flat shift
    tap_off = tuple(kd * HpWp + kh * Wp + kw
                    for kd in range(3) for kh in range(3) for kw in range(3))

    # validity mask over flat base positions (0 on wrap-around / tail garbage)
    idx = jnp.arange(NOUT)
    dd, rr = idx // HpWp, idx % HpWp
    hh, ww = rr // Wp, rr % Wp
    mask = ((dd < D) & (hh < H) & (ww < W)).astype(jnp.float32).reshape(1, NOUT)
    n_valid = float(D * H * W)

    conv_call = pl.pallas_call(
        functools.partial(_repvgg_conv_kernel, tap_offsets=tap_off, tn=TN, win=WIN),
        grid=(B, n_tiles),
        in_specs=[
            pl.BlockSpec((1, TN), lambda b, t: (0, t)),             # mask
            pl.BlockSpec(memory_space=pl.ANY),                      # padded flat x (HBM)
            pl.BlockSpec((27, Cout, Cout), lambda b, t: (0, 0, 0)),  # folded taps
        ],
        out_specs=(
            pl.BlockSpec((None, Cout, TN), lambda b, t: (b, 0, t)),
            pl.BlockSpec((None, Cout, 2), lambda b, t: (b, 0, 0)),   # revisited across t
        ),
        out_shape=(
            jax.ShapeDtypeStruct((B, Cout, NOUT), jnp.float32),
            jax.ShapeDtypeStruct((B, Cout, 2), jnp.float32),
        ),
        scratch_shapes=[
            pltpu.VMEM((2, Cout, WIN), jnp.bfloat16),                # double-buffered halo
            pltpu.SemaphoreType.DMA((2,)),
        ],
        compiler_params=pltpu.CompilerParams(
            dimension_semantics=("parallel", "arbitrary"),
            vmem_limit_bytes=48 * 1024 * 1024),
        cost_estimate=pl.CostEstimate(
            flops=2 * B * NOUT * 27 * Cout * Cout, transcendentals=0,
            bytes_accessed=2 * B * n_tiles * Cout * WIN + 4 * B * Cout * NOUT),
    )

    norm_call = pl.pallas_call(
        _norm_silu_kernel,
        grid=(B, n_tiles),
        in_specs=[
            pl.BlockSpec((None, Cout, TN), lambda b, t: (b, 0, t)),  # z
            pl.BlockSpec((None, Cout, 1), lambda b, t: (b, 0, 0)),   # mean
            pl.BlockSpec((None, Cout, 1), lambda b, t: (b, 0, 0)),   # rsqrt(var+eps)
            pl.BlockSpec((1, TN), lambda b, t: (0, t)),              # mask
        ],
        out_specs=pl.BlockSpec((None, Cout, TN), lambda b, t: (b, 0, t)),
        out_shape=jax.ShapeDtypeStruct((B, Cout, NOUT), jnp.bfloat16),
        compiler_params=pltpu.CompilerParams(
            dimension_semantics=("parallel", "parallel"),
            vmem_limit_bytes=48 * 1024 * 1024),
        cost_estimate=pl.CostEstimate(
            flops=6 * B * NOUT * Cout, transcendentals=B * NOUT * Cout,
            bytes_accessed=6 * B * Cout * NOUT),
    )

    # initial padded-flat bf16 input from the downsample output
    y_pad5 = jnp.pad(y0, ((0, 0), (0, 0), (1, 1), (1, 1), (1, 1)))
    x_flat = jnp.pad(y_pad5.reshape(B, Cout, Dp * HpWp),
                     ((0, 0), (0, 0), (0, NTOT - Dp * HpWp))).astype(jnp.bfloat16)

    eye = jnp.eye(Cout, dtype=jnp.float32)
    yb = None
    for blk in params["blocks"]:
        # exact RepVGG fold: conv1x1 + alpha*I added to the centre tap (k = 13)
        w_folded = blk["w3"].at[13].add(blk["w1"] + blk["alpha"] * eye)
        z, stats = conv_call(mask, x_flat, w_folded.astype(jnp.bfloat16))
        mean = stats[:, :, 0:1] / n_valid
        var = stats[:, :, 1:2] / n_valid - mean * mean
        inv = lax.rsqrt(var + EPS)
        yb = norm_call(z, mean, inv, mask)               # (B, Cout, NOUT) bf16, masked
        # next block's zero-padded flat input: valid voxels shift by (1,1,1) flat offset
        x_flat = jnp.pad(yb, ((0, 0), (0, 0), (SHIFT, NTOT - NOUT - SHIFT)))

    out = yb[:, :, :D * HpWp].reshape(B, Cout, D, Hp, Wp)[:, :, :, :H, :W]
    return out.astype(jnp.float32)


# ---------------------------------------------------------------------------
# Pure-JAX references (lax.conv) for correctness checks
# ---------------------------------------------------------------------------
def _w3_to_oidhw(w3):
    co, ci = w3.shape[1], w3.shape[2]
    return jnp.transpose(w3, (1, 2, 0)).reshape(co, ci, 3, 3, 3)


def _conv3d(x, w, stride, pad):
    return lax.conv_general_dilated(
        x, w, (stride,) * 3, ((pad, pad),) * 3,
        dimension_numbers=("NCDHW", "OIDHW", "NCDHW"),
        precision=lax.Precision.HIGHEST)


def _check_reparam_fold(blk, C, key):
    """Folded conv == conv3x3 + conv1x1 + alpha*x (the literal torch forward), in f32."""
    t = jax.random.normal(key, (1, C, 5, 6, 7), jnp.float32)
    eye = jnp.eye(C, dtype=jnp.float32)
    w_folded = blk["w3"].at[13].add(blk["w1"] + blk["alpha"] * eye)
    lhs = _conv3d(t, _w3_to_oidhw(w_folded), 1, 1)
    rhs = (_conv3d(t, _w3_to_oidhw(blk["w3"]), 1, 1)
           + _conv3d(t, blk["w1"].reshape(C, C, 1, 1, 1), 1, 0)
           + blk["alpha"] * t)
    np.testing.assert_allclose(np.asarray(lhs), np.asarray(rhs), rtol=1e-5, atol=1e-5)


def ref_forward(x, params):
    # Same math as the torch module, with the same bf16 quantisation points as the
    # kernel path (bf16 conv operands, f32 accumulation/stats), so the comparison
    # isolates the Pallas kernels' tiling / DMA / masked-stats logic.
    bf = lambda a: a.astype(jnp.bfloat16).astype(jnp.float32)
    Cout = params["down_w"].shape[0]
    Cin = x.shape[1]
    wd = jnp.transpose(params["down_w"].reshape(Cout, 27, Cin), (0, 2, 1)).reshape(
        Cout, Cin, 3, 3, 3)
    y = _conv3d(bf(x), bf(wd), 2, 1) + params["down_b"].reshape(1, Cout, 1, 1, 1)
    eye = jnp.eye(Cout, dtype=jnp.float32)
    for blk in params["blocks"]:
        xin = bf(y)
        # fold is exact algebra (validated by _check_reparam_fold); quantised at the
        # same point as the kernel path.
        w_folded = blk["w3"].at[13].add(blk["w1"] + blk["alpha"] * eye)
        z = _conv3d(xin, bf(_w3_to_oidhw(w_folded)), 1, 1)
        m = jnp.mean(z, axis=(2, 3, 4), keepdims=True)
        v = jnp.mean((z - m) ** 2, axis=(2, 3, 4), keepdims=True)
        zh = (z - m) * lax.rsqrt(v + EPS)
        y = bf(zh * jax.nn.sigmoid(zh))
    return y


# ---------------------------------------------------------------------------
if __name__ == "__main__":
    B, Cin, Cout = 2, 4, 8
    D0 = H0 = W0 = 16
    num_blocks = 2

    key = jax.random.PRNGKey(0)
    k_x, k_dw, k_db, k_t, *k_blk = jax.random.split(key, 4 + 2 * num_blocks)

    x = jax.random.normal(k_x, (B, Cin, D0, H0, W0), jnp.float32)
    params = {
        "down_w": 0.1 * jax.random.normal(k_dw, (Cout, 27 * Cin), jnp.float32),
        "down_b": 0.1 * jax.random.normal(k_db, (Cout,), jnp.float32),
        "blocks": [
            {
                "w3": 0.05 * jax.random.normal(k_blk[2 * i], (27, Cout, Cout), jnp.float32),
                "w1": 0.05 * jax.random.normal(k_blk[2 * i + 1], (Cout, Cout), jnp.float32),
                "alpha": jnp.float32(1.0),      # torch.ones(1) init
            }
            for i in range(num_blocks)
        ],
    }

    run = jax.jit(lambda xx, pp: unet3d_encoder_stage(xx, pp))
    out = jax.block_until_ready(run(x, params))
    assert out.shape == (B, Cout, D0 // 2, H0 // 2, W0 // 2), out.shape

    # 1) the fold used by the wrapper reproduces the literal three-branch torch forward
    _check_reparam_fold(params["blocks"][0], Cout, k_t)

    # 2) end-to-end check vs. a lax.conv reference with mirrored bf16 quantisation.
    #    Tolerance covers one bf16 ulp (~0.4%) on the bf16 inter-block activations.
    ref = jax.block_until_ready(ref_forward(x, params))
    np.testing.assert_allclose(np.asarray(out), np.asarray(ref), rtol=1e-2, atol=1e-2)
    print("KERNEL_OK")
</pallas_src>

<mosaic_0001>
module attributes {stable_mosaic.version = 11 : i64} {
  func.func @_down_kernel(%arg0: i32, %arg1: i32, %arg2: memref<1x108x256xbf16, #tpu.memory_space<vmem>>, %arg3: memref<8x108xbf16, #tpu.memory_space<vmem>>, %arg4: memref<8x1xf32, #tpu.memory_space<vmem>>, %arg5: memref<1x8x256xf32, #tpu.memory_space<vmem>>) attributes {dimension_semantics = [#tpu.dimension_semantics<parallel>, #tpu.dimension_semantics<parallel>], iteration_bounds = array<i64: 2, 2>, scalar_prefetch = 0 : i64, scratch_operands = 0 : i64, tpu.core_type = #tpu.core_type<tc>, window_params = [{transform_indices = @transform_0, window_bounds = array<i64: 1, 108, 256>}, {pipeline_mode = #tpu.pipeline_mode<synchronous>, transform_indices = @transform_1, window_bounds = array<i64: 8, 108>}, {pipeline_mode = #tpu.pipeline_mode<synchronous>, transform_indices = @transform_2, window_bounds = array<i64: 8, 1>}, {transform_indices = @transform_3, window_bounds = array<i64: 1, 8, 256>}]} {
    %c0 = arith.constant 0 : index
    %c0_0 = arith.constant 0 : index
    %0 = vector.load %arg3[%c0, %c0_0] : memref<8x108xbf16, #tpu.memory_space<vmem>>, vector<8x108xbf16>
    %c0_1 = arith.constant 0 : index
    %c0_2 = arith.constant 0 : index
    %c0_3 = arith.constant 0 : index
    %1 = vector.load %arg2[%c0_1, %c0_2, %c0_3] : memref<1x108x256xbf16, #tpu.memory_space<vmem>>, vector<1x108x256xbf16>
    %2 = vector.shape_cast %1 : vector<1x108x256xbf16> to vector<108x256xbf16>
    %cst = arith.constant dense<0.000000e+00> : vector<8x256xf32>
    %3 = tpu.matmul %0, %2, %cst {dimension_numbers = #tpu.dot_dimension_numbers<[1], [0], [0], [1], [0, 0, 1, 1], [], []>} : vector<8x108xbf16>, vector<108x256xbf16>, vector<8x256xf32> -> vector<8x256xf32>
    %c0_4 = arith.constant 0 : index
    %c0_5 = arith.constant 0 : index
    %4 = vector.load %arg4[%c0_4, %c0_5] : memref<8x1xf32, #tpu.memory_space<vmem>>, vector<8x1xf32>
    %5 = vector.broadcast %4 : vector<8x1xf32> to vector<8x256xf32>
    %6 = arith.addf %3, %5 : vector<8x256xf32>
    %c0_6 = arith.constant 0 : index
    %c0_7 = arith.constant 0 : index
    %c0_8 = arith.constant 0 : index
    %7 = vector.load %arg5[%c0_6, %c0_7, %c0_8] : memref<1x8x256xf32, #tpu.memory_space<vmem>>, vector<1x8x256xf32>
    %8 = vector.shape_cast %7 : vector<1x8x256xf32> to vector<8x256xf32>
    %9 = vector.shape_cast %6 : vector<8x256xf32> to vector<1x8x256xf32>
    tpu.vector_store %arg5[%c0_6, %c0_7, %c0_8], %9 {strides = array<i32>} : memref<1x8x256xf32, #tpu.memory_space<vmem>>, vector<1x8x256xf32>,
    return
  }
  func.func @transform_0(%arg0: i32, %arg1: i32) -> (i32, i32, i32) {
    %c0_i32 = arith.constant 0 : i32
    %c0_i32_0 = arith.constant 0 : i32
    return %arg0, %c0_i32, %arg1 : i32, i32, i32
  }
  func.func @transform_1(%arg0: i32, %arg1: i32) -> (i32, i32) {
    %c0_i32 = arith.constant 0 : i32
    %c0_i32_0 = arith.constant 0 : i32
    %c0_i32_1 = arith.constant 0 : i32
    return %c0_i32, %c0_i32_0 : i32, i32
  }
  func.func @transform_2(%arg0: i32, %arg1: i32) -> (i32, i32) {
    %c0_i32 = arith.constant 0 : i32
    %c0_i32_0 = arith.constant 0 : i32
    %c0_i32_1 = arith.constant 0 : i32
    return %c0_i32, %c0_i32_0 : i32, i32
  }
  func.func @transform_3(%arg0: i32, %arg1: i32) -> (i32, i32, i32) {
    %c0_i32 = arith.constant 0 : i32
    %c0_i32_0 = arith.constant 0 : i32
    return %arg0, %c0_i32, %arg1 : i32, i32, i32
  }
}

module attributes {stable_mosaic.version = 11 : i64} {
  func.func @_repvgg_conv_kernel(%arg0: i32, %arg1: i32, %arg2: memref<1x512xf32, #tpu.memory_space<vmem>>, %arg3: memref<2x8x1280xbf16, #tpu.memory_space<any>>, %arg4: memref<27x8x8xbf16, #tpu.memory_space<vmem>>, %arg5: memref<1x8x512xf32, #tpu.memory_space<vmem>>, %arg6: memref<1x8x2xf32, #tpu.memory_space<vmem>>, %arg7: memref<2x8x768xbf16, #tpu.memory_space<vmem>>, %arg8: memref<2x!tpu.dma_semaphore, #tpu.memory_space<semaphore_mem>>) attributes {dimension_semantics = [#tpu.dimension_semantics<parallel>, #tpu.dimension_semantics<arbitrary>], iteration_bounds = array<i64: 2, 2>, scalar_prefetch = 0 : i64, scratch_operands = 2 : i64, tpu.core_type = #tpu.core_type<tc>, window_params = [{transform_indices = @transform_0, window_bounds = array<i64: 1, 512>}, {}, {pipeline_mode = #tpu.pipeline_mode<synchronous>, transform_indices = @transform_2, window_bounds = array<i64: 27, 8, 8>}, {transform_indices = @transform_3, window_bounds = array<i64: 1, 8, 512>}, {transform_indices = @transform_4, window_bounds = array<i64: 1, 8, 2>}]} {
    %c2_i32 = arith.constant 2 : i32
    %c0_i32 = arith.constant 0 : i32
    %0 = arith.cmpi eq, %c2_i32, %c0_i32 : i32
    %c1_i32 = arith.constant 1 : i32
    %1 = arith.select %0, %c1_i32, %c2_i32 : i32
    %2 = arith.remsi %arg1, %1 : i32
    %c0_i32_0 = arith.constant 0 : i32
    %3 = arith.cmpi ne, %2, %c0_i32_0 : i32
    %c0_i32_1 = arith.constant 0 : i32
    %4 = arith.cmpi slt, %2, %c0_i32_1 : i32
    %c0_i32_2 = arith.constant 0 : i32
    %5 = arith.cmpi slt, %1, %c0_i32_2 : i32
    %6 = arith.xori %4, %5 : i1
    %7 = arith.andi %6, %3 : i1
    %8 = arith.addi %2, %1 : i32
    %9 = arith.select %7, %8, %2 : i32
    %c0_i32_3 = arith.constant 0 : i32
    %10 = arith.cmpi eq, %arg1, %c0_i32_3 : i32
    %11 = arith.extui %10 : i1 to i32
    %c0_i32_4 = arith.constant 0 : i32
    %12 = arith.cmpi ne, %11, %c0_i32_4 : i32
    scf.if %12 {
      %c512_i32 = arith.constant 512 : i32
      %183 = arith.muli %arg1, %c512_i32 : i32
      %184 = tpu.assume_multiple %183, 128 : i32
      %c0_i32_110 = arith.constant 0 : i32
      %185 = tpu.memref_slice %arg3[%arg0, %c0_i32_110, %184] : memref<2x8x1280xbf16, #tpu.memory_space<any>> -> memref<1x8x768xbf16, #tpu.memory_space<any>>
      %186 = tpu.memref_squeeze %185 : memref<1x8x768xbf16, #tpu.memory_space<any>> -> memref<8x768xbf16, #tpu.memory_space<any>>
      %c0_i32_111 = arith.constant 0 : i32
      %c0_i32_112 = arith.constant 0 : i32
      %187 = tpu.memref_slice %arg7[%9, %c0_i32_111, %c0_i32_112] : memref<2x8x768xbf16, #tpu.memory_space<vmem>> -> memref<1x8x768xbf16, #tpu.memory_space<vmem>>
      %188 = tpu.memref_squeeze %187 : memref<1x8x768xbf16, #tpu.memory_space<vmem>> -> memref<8x768xbf16, #tpu.memory_space<vmem>>
      %189 = tpu.memref_slice %arg8[%9] : memref<2x!tpu.dma_semaphore, #tpu.memory_space<semaphore_mem>> -> memref<1x!tpu.dma_semaphore, #tpu.memory_space<semaphore_mem>>
      %190 = tpu.memref_squeeze %189 : memref<1x!tpu.dma_semaphore, #tpu.memory_space<semaphore_mem>> -> memref<!tpu.dma_semaphore, #tpu.memory_space<semaphore_mem>>
      tpu.enqueue_dma source(%186 : memref<8x768xbf16, #tpu.memory_space<any>>) target(%188 : memref<8x768xbf16, #tpu.memory_space<vmem>>) target_semaphore(%190 : memref<!tpu.dma_semaphore, #tpu.memory_space<semaphore_mem>>)
    } else {
    }
    %c1_i32_5 = arith.constant 1 : i32
    %13 = arith.addi %arg1, %c1_i32_5 : i32
    %c2_i32_6 = arith.constant 2 : i32
    %14 = arith.cmpi slt, %13, %c2_i32_6 : i32
    %15 = arith.extui %14 : i1 to i32
    %c0_i32_7 = arith.constant 0 : i32
    %16 = arith.cmpi ne, %15, %c0_i32_7 : i32
    scf.if %16 {
      %c1_i32_110 = arith.constant 1 : i32
      %183 = arith.addi %arg1, %c1_i32_110 : i32
      %c1_i32_111 = arith.constant 1 : i32
      %184 = arith.subi %c1_i32_111, %9 : i32
      %c512_i32 = arith.constant 512 : i32
      %185 = arith.muli %183, %c512_i32 : i32
      %186 = tpu.assume_multiple %185, 128 : i32
      %c0_i32_112 = arith.constant 0 : i32
      %187 = tpu.memref_slice %arg3[%arg0, %c0_i32_112, %186] : memref<2x8x1280xbf16, #tpu.memory_space<any>> -> memref<1x8x768xbf16, #tpu.memory_space<any>>
      %188 = tpu.memref_squeeze %187 : memref<1x8x768xbf16, #tpu.memory_space<any>> -> memref<8x768xbf16, #tpu.memory_space<any>>
      %c0_i32_113 = arith.constant 0 : i32
      %c0_i32_114 = arith.constant 0 : i32
      %189 = tpu.memref_slice %arg7[%184, %c0_i32_113, %c0_i32_114] : memref<2x8x768xbf16, #tpu.memory_space<vmem>> -> memref<1x8x768xbf16, #tpu.memory_space<vmem>>
      %190 = tpu.memref_squeeze %189 : memref<1x8x768xbf16, #tpu.memory_space<vmem>> -> memref<8x768xbf16, #tpu.memory_space<vmem>>
      %191 = tpu.memref_slice %arg8[%184] : memref<2x!tpu.dma_semaphore, #tpu.memory_space<semaphore_mem>> -> memref<1x!tpu.dma_semaphore, #tpu.memory_space<semaphore_mem>>
      %192 = tpu.memref_squeeze %191 : memref<1x!tpu.dma_semaphore, #tpu.memory_space<semaphore_mem>> -> memref<!tpu.dma_semaphore, #tpu.memory_space<semaphore_mem>>
      tpu.enqueue_dma source(%188 : memref<8x768xbf16, #tpu.memory_space<any>>) target(%190 : memref<8x768xbf16, #tpu.memory_space<vmem>>) target_semaphore(%192 : memref<!tpu.dma_semaphore, #tpu.memory_space<semaphore_mem>>)
    } else {
    }
    %c0_i32_8 = arith.constant 0 : i32
    %c0_i32_9 = arith.constant 0 : i32
    %17 = tpu.memref_slice %arg3[%arg0, %c0_i32_8, %c0_i32_9] : memref<2x8x1280xbf16, #tpu.memory_space<any>> -> memref<1x8x768xbf16, #tpu.memory_space<any>>
    %18 = tpu.memref_squeeze %17 : memref<1x8x768xbf16, #tpu.memory_space<any>> -> memref<8x768xbf16, #tpu.memory_space<any>>
    %c0_i32_10 = arith.constant 0 : i32
    %c0_i32_11 = arith.constant 0 : i32
    %19 = tpu.memref_slice %arg7[%9, %c0_i32_10, %c0_i32_11] : memref<2x8x768xbf16, #tpu.memory_space<vmem>> -> memref<1x8x768xbf16, #tpu.memory_space<vmem>>
    %20 = tpu.memref_squeeze %19 : memref<1x8x768xbf16, #tpu.memory_space<vmem>> -> memref<8x768xbf16, #tpu.memory_space<vmem>>
    %21 = tpu.memref_slice %arg8[%9] : memref<2x!tpu.dma_semaphore, #tpu.memory_space<semaphore_mem>> -> memref<1x!tpu.dma_semaphore, #tpu.memory_space<semaphore_mem>>
    %22 = tpu.memref_squeeze %21 : memref<1x!tpu.dma_semaphore, #tpu.memory_space<semaphore_mem>> -> memref<!tpu.dma_semaphore, #tpu.memory_space<semaphore_mem>>
    tpu.wait_dma2 semaphore(%22 : memref<!tpu.dma_semaphore, #tpu.memory_space<semaphore_mem>>) src(%18 : memref<8x768xbf16, #tpu.memory_space<any>>) dst(%20 : memref<8x768xbf16, #tpu.memory_space<vmem>>)
    %23 = arith.index_cast %9 : i32 to index
    %c0 = arith.constant 0 : index
    %c0_12 = arith.constant 0 : index
    %24 = vector.load %arg7[%23, %c0, %c0_12] : memref<2x8x768xbf16, #tpu.memory_space<vmem>>, vector<1x8x768xbf16>
    %25 = vector.shape_cast %24 : vector<1x8x768xbf16> to vector<8x768xbf16>
    %cst = arith.constant 0.000000e+00 : f32
    %26 = vector.broadcast %cst : f32 to vector<8x512xf32>
    %27 = vector.extract_strided_slice %25 {offsets = [0, 0], sizes = [8, 512], strides = [1, 1]} : vector<8x768xbf16> to vector<8x512xbf16>
    %c0_13 = arith.constant 0 : index
    %c0_14 = arith.constant 0 : index
    %c0_15 = arith.constant 0 : index
    %28 = vector.load %arg4[%c0_13, %c0_14, %c0_15] : memref<27x8x8xbf16, #tpu.memory_space<vmem>>, vector<1x8x8xbf16>
    %29 = vector.shape_cast %28 : vector<1x8x8xbf16> to vector<8x8xbf16>
    %cst_16 = arith.constant dense<0.000000e+00> : vector<8x512xf32>
    %30 = tpu.matmul %29, %27, %cst_16 {dimension_numbers = #tpu.dot_dimension_numbers<[1], [0], [0], [1], [0, 0, 1, 1], [], []>} : vector<8x8xbf16>, vector<8x512xbf16>, vector<8x512xf32> -> vector<8x512xf32>
    %31 = arith.addf %26, %30 : vector<8x512xf32>
    %32 = vector.extract_strided_slice %25 {offsets = [0, 1], sizes = [8, 512], strides = [1, 1]} : vector<8x768xbf16> to vector<8x512xbf16>
    %c1 = arith.constant 1 : index
    %c0_17 = arith.constant 0 : index
    %c0_18 = arith.constant 0 : index
    %33 = vector.load %arg4[%c1, %c0_17, %c0_18] : memref<27x8x8xbf16, #tpu.memory_space<vmem>>, vector<1x8x8xbf16>
    %34 = vector.shape_cast %33 : vector<1x8x8xbf16> to vector<8x8xbf16>
    %cst_19 = arith.constant dense<0.000000e+00> : vector<8x512xf32>
    %35 = tpu.matmul %34, %32, %cst_19 {dimension_numbers = #tpu.dot_dimension_numbers<[1], [0], [0], [1], [0, 0, 1, 1], [], []>} : vector<8x8xbf16>, vector<8x512xbf16>, vector<8x512xf32> -> vector<8x512xf32>
    %36 = arith.addf %31, %35 : vector<8x512xf32>
    %37 = vector.extract_strided_slice %25 {offsets = [0, 2], sizes = [8, 512], strides = [1, 1]} : vector<8x768xbf16> to vector<8x512xbf16>
    %c2 = arith.constant 2 : index
    %c0_20 = arith.constant 0 : index
    %c0_21 = arith.constant 0 : index
    %38 = vector.load %arg4[%c2, %c0_20, %c0_21] : memref<27x8x8xbf16, #tpu.memory_space<vmem>>, vector<1x8x8xbf16>
    %39 = vector.shape_cast %38 : vector<1x8x8xbf16> to vector<8x8xbf16>
    %cst_22 = arith.constant dense<0.000000e+00> : vector<8x512xf32>
    %40 = tpu.matmul %39, %37, %cst_22 {dimension_numbers = #tpu.dot_dimension_numbers<[1], [0], [0], [1], [0, 0, 1, 1], [], []>} : vector<8x8xbf16>, vector<8x512xbf16>, vector<8x512xf32> -> vector<8x512xf32>
    %41 = arith.addf %36, %40 : vector<8x512xf32>
    %42 = vector.extract_strided_slice %25 {offsets = [0, 10], sizes = [8, 512], strides = [1, 1]} : vector<8x768xbf16> to vector<8x512xbf16>
    %c3 = arith.constant 3 : index
    %c0_23 = arith.constant 0 : index
    %c0_24 = arith.constant 0 : index
    %43 = vector.load %arg4[%c3, %c0_23, %c0_24] : memref<27x8x8xbf16, #tpu.memory_space<vmem>>, vector<1x8x8xbf16>
    %44 = vector.shape_cast %43 : vector<1x8x8xbf16> to vector<8x8xbf16>
    %cst_25 = arith.constant dense<0.000000e+00> : vector<8x512xf32>
    %45 = tpu.matmul %44, %42, %cst_25 {dimension_numbers = #tpu.dot_dimension_numbers<[1], [0], [0], [1], [0, 0, 1, 1], [], []>} : vector<8x8xbf16>, vector<8x512xbf16>, vector<8x512xf32> -> vector<8x512xf32>
    %46 = arith.addf %41, %45 : vector<8x512xf32>
    %47 = vector.extract_strided_slice %25 {offsets = [0, 11], sizes = [8, 512], strides = [1, 1]} : vector<8x768xbf16> to vector<8x512xbf16>
    %c4 = arith.constant 4 : index
    %c0_26 = arith.constant 0 : index
    %c0_27 = arith.constant 0 : index
    %48 = vector.load %arg4[%c4, %c0_26, %c0_27] : memref<27x8x8xbf16, #tpu.memory_space<vmem>>, vector<1x8x8xbf16>
    %49 = vector.shape_cast %48 : vector<1x8x8xbf16> to vector<8x8xbf16>
    %cst_28 = arith.constant dense<0.000000e+00> : vector<8x512xf32>
    %50 = tpu.matmul %49, %47, %cst_28 {dimension_numbers = #tpu.dot_dimension_numbers<[1], [0], [0], [1], [0, 0, 1, 1], [], []>} : vector<8x8xbf16>, vector<8x512xbf16>, vector<8x512xf32> -> vector<8x512xf32>
    %51 = arith.addf %46, %50 : vector<8x512xf32>
    %52 = vector.extract_strided_slice %25 {offsets = [0, 12], sizes = [8, 512], strides = [1, 1]} : vector<8x768xbf16> to vector<8x512xbf16>
    %c5 = arith.constant 5 : index
    %c0_29 = arith.constant 0 : index
    %c0_30 = arith.constant 0 : index
    %53 = vector.load %arg4[%c5, %c0_29, %c0_30] : memref<27x8x8xbf16, #tpu.memory_space<vmem>>, vector<1x8x8xbf16>
    %54 = vector.shape_cast %53 : vector<1x8x8xbf16> to vector<8x8xbf16>
    %cst_31 = arith.constant dense<0.000000e+00> : vector<8x512xf32>
    %55 = tpu.matmul %54, %52, %cst_31 {dimension_numbers = #tpu.dot_dimension_numbers<[1], [0], [0], [1], [0, 0, 1, 1], [], []>} : vector<8x8xbf16>, vector<8x512xbf16>, vector<8x512xf32> -> vector<8x512xf32>
    %56 = arith.addf %51, %55 : vector<8x512xf32>
    %57 = vector.extract_strided_slice %25 {offsets = [0, 20], sizes = [8, 512], strides = [1, 1]} : vector<8x768xbf16> to vector<8x512xbf16>
    %c6 = arith.constant 6 : index
    %c0_32 = arith.constant 0 : index
    %c0_33 = arith.constant 0 : index
    %58 = vector.load %arg4[%c6, %c0_32, %c0_33] : memref<27x8x8xbf16, #tpu.memory_space<vmem>>, vector<1x8x8xbf16>
    %59 = vector.shape_cast %58 : vector<1x8x8xbf16> to vector<8x8xbf16>
    %cst_34 = arith.constant dense<0.000000e+00> : vector<8x512xf32>
    %60 = tpu.matmul %59, %57, %cst_34 {dimension_numbers = #tpu.dot_dimension_numbers<[1], [0], [0], [1], [0, 0, 1, 1], [], []>} : vector<8x8xbf16>, vector<8x512xbf16>, vector<8x512xf32> -> vector<8x512xf32>
    %61 = arith.addf %56, %60 : vector<8x512xf32>
    %62 = vector.extract_strided_slice %25 {offsets = [0, 21], sizes = [8, 512], strides = [1, 1]} : vector<8x768xbf16> to vector<8x512xbf16>
    %c7 = arith.constant 7 : index
    %c0_35 = arith.constant 0 : index
    %c0_36 = arith.constant 0 : index
    %63 = vector.load %arg4[%c7, %c0_35, %c0_36] : memref<27x8x8xbf16, #tpu.memory_space<vmem>>, vector<1x8x8xbf16>
    %64 = vector.shape_cast %63 : vector<1x8x8xbf16> to vector<8x8xbf16>
    %cst_37 = arith.constant dense<0.000000e+00> : vector<8x512xf32>
    %65 = tpu.matmul %64, %62, %cst_37 {dimension_numbers = #tpu.dot_dimension_numbers<[1], [0], [0], [1], [0, 0, 1, 1], [], []>} : vector<8x8xbf16>, vector<8x512xbf16>, vector<8x512xf32> -> vector<8x512xf32>
    %66 = arith.addf %61, %65 : vector<8x512xf32>
    %67 = vector.extract_strided_slice %25 {offsets = [0, 22], sizes = [8, 512], strides = [1, 1]} : vector<8x768xbf16> to vector<8x512xbf16>
    %c8 = arith.constant 8 : index
    %c0_38 = arith.constant 0 : index
    %c0_39 = arith.constant 0 : index
    %68 = vector.load %arg4[%c8, %c0_38, %c0_39] : memref<27x8x8xbf16, #tpu.memory_space<vmem>>, vector<1x8x8xbf16>
    %69 = vector.shape_cast %68 : vector<1x8x8xbf16> to vector<8x8xbf16>
    %cst_40 = arith.constant dense<0.000000e+00> : vector<8x512xf32>
    %70 = tpu.matmul %69, %67, %cst_40 {dimension_numbers = #tpu.dot_dimension_numbers<[1], [0], [0], [1], [0, 0, 1, 1], [], []>} : vector<8x8xbf16>, vector<8x512xbf16>, vector<8x512xf32> -> vector<8x512xf32>
    %71 = arith.addf %66, %70 : vector<8x512xf32>
    %72 = vector.extract_strided_slice %25 {offsets = [0, 100], sizes = [8, 512], strides = [1, 1]} : vector<8x768xbf16> to vector<8x512xbf16>
    %c9 = arith.constant 9 : index
    %c0_41 = arith.constant 0 : index
    %c0_42 = arith.constant 0 : index
    %73 = vector.load %arg4[%c9, %c0_41, %c0_42] : memref<27x8x8xbf16, #tpu.memory_space<vmem>>, vector<1x8x8xbf16>
    %74 = vector.shape_cast %73 : vector<1x8x8xbf16> to vector<8x8xbf16>
    %cst_43 = arith.constant dense<0.000000e+00> : vector<8x512xf32>
    %75 = tpu.matmul %74, %72, %cst_43 {dimension_numbers = #tpu.dot_dimension_numbers<[1], [0], [0], [1], [0, 0, 1, 1], [], []>} : vector<8x8xbf16>, vector<8x512xbf16>, vector<8x512xf32> -> vector<8x512xf32>
    %76 = arith.addf %71, %75 : vector<8x512xf32>
    %77 = vector.extract_strided_slice %25 {offsets = [0, 101], sizes = [8, 512], strides = [1, 1]} : vector<8x768xbf16> to vector<8x512xbf16>
    %c10 = arith.constant 10 : index
    %c0_44 = arith.constant 0 : index
    %c0_45 = arith.constant 0 : index
    %78 = vector.load %arg4[%c10, %c0_44, %c0_45] : memref<27x8x8xbf16, #tpu.memory_space<vmem>>, vector<1x8x8xbf16>
    %79 = vector.shape_cast %78 : vector<1x8x8xbf16> to vector<8x8xbf16>
    %cst_46 = arith.constant dense<0.000000e+00> : vector<8x512xf32>
    %80 = tpu.matmul %79, %77, %cst_46 {dimension_numbers = #tpu.dot_dimension_numbers<[1], [0], [0], [1], [0, 0, 1, 1], [], []>} : vector<8x8xbf16>, vector<8x512xbf16>, vector<8x512xf32> -> vector<8x512xf32>
    %81 = arith.addf %76, %80 : vector<8x512xf32>
    %82 = vector.extract_strided_slice %25 {offsets = [0, 102], sizes = [8, 512], strides = [1, 1]} : vector<8x768xbf16> to vector<8x512xbf16>
    %c11 = arith.constant 11 : index
    %c0_47 = arith.constant 0 : index
    %c0_48 = arith.constant 0 : index
    %83 = vector.load %arg4[%c11, %c0_47, %c0_48] : memref<27x8x8xbf16, #tpu.memory_space<vmem>>, vector<1x8x8xbf16>
    %84 = vector.shape_cast %83 : vector<1x8x8xbf16> to vector<8x8xbf16>
    %cst_49 = arith.constant dense<0.000000e+00> : vector<8x512xf32>
    %85 = tpu.matmul %84, %82, %cst_49 {dimension_numbers = #tpu.dot_dimension_numbers<[1], [0], [0], [1], [0, 0, 1, 1], [], []>} : vector<8x8xbf16>, vector<8x512xbf16>, vector<8x512xf32> -> vector<8x512xf32>
    %86 = arith.addf %81, %85 : vector<8x512xf32>
    %87 = vector.extract_strided_slice %25 {offsets = [0, 110], sizes = [8, 512], strides = [1, 1]} : vector<8x768xbf16> to vector<8x512xbf16>
    %c12 = arith.constant 12 : index
    %c0_50 = arith.constant 0 : index
    %c0_51 = arith.constant 0 : index
    %88 = vector.load %arg4[%c12, %c0_50, %c0_51] : memref<27x8x8xbf16, #tpu.memory_space<vmem>>, vector<1x8x8xbf16>
    %89 = vector.shape_cast %88 : vector<1x8x8xbf16> to vector<8x8xbf16>
    %cst_52 = arith.constant dense<0.000000e+00> : vector<8x512xf32>
    %90 = tpu.matmul %89, %87, %cst_52 {dimension_numbers = #tpu.dot_dimension_numbers<[1], [0], [0], [1], [0, 0, 1, 1], [], []>} : vector<8x8xbf16>, vector<8x512xbf16>, vector<8x512xf32> -> vector<8x512xf32>
    %91 = arith.addf %86, %90 : vector<8x512xf32>
    %92 = vector.extract_strided_slice %25 {offsets = [0, 111], sizes = [8, 512], strides = [1, 1]} : vector<8x768xbf16> to vector<8x512xbf16>
    %c13 = arith.constant 13 : index
    %c0_53 = arith.constant 0 : index
    %c0_54 = arith.constant 0 : index
    %93 = vector.load %arg4[%c13, %c0_53, %c0_54] : memref<27x8x8xbf16, #tpu.memory_space<vmem>>, vector<1x8x8xbf16>
    %94 = vector.shape_cast %93 : vector<1x8x8xbf16> to vector<8x8xbf16>
    %cst_55 = arith.constant dense<0.000000e+00> : vector<8x512xf32>
    %95 = tpu.matmul %94, %92, %cst_55 {dimension_numbers = #tpu.dot_dimension_numbers<[1], [0], [0], [1], [0, 0, 1, 1], [], []>} : vector<8x8xbf16>, vector<8x512xbf16>, vector<8x512xf32> -> vector<8x512xf32>
    %96 = arith.addf %91, %95 : vector<8x512xf32>
    %97 = vector.extract_strided_slice %25 {offsets = [0, 112], sizes = [8, 512], strides = [1, 1]} : vector<8x768xbf16> to vector<8x512xbf16>
    %c14 = arith.constant 14 : index
    %c0_56 = arith.constant 0 : index
    %c0_57 = arith.constant 0 : index
    %98 = vector.load %arg4[%c14, %c0_56, %c0_57] : memref<27x8x8xbf16, #tpu.memory_space<vmem>>, vector<1x8x8xbf16>
    %99 = vector.shape_cast %98 : vector<1x8x8xbf16> to vector<8x8xbf16>
    %cst_58 = arith.constant dense<0.000000e+00> : vector<8x512xf32>
    %100 = tpu.matmul %99, %97, %cst_58 {dimension_numbers = #tpu.dot_dimension_numbers<[1], [0], [0], [1], [0, 0, 1, 1], [], []>} : vector<8x8xbf16>, vector<8x512xbf16>, vector<8x512xf32> -> vector<8x512xf32>
    %101 = arith.addf %96, %100 : vector<8x512xf32>
    %102 = vector.extract_strided_slice %25 {offsets = [0, 120], sizes = [8, 512], strides = [1, 1]} : vector<8x768xbf16> to vector<8x512xbf16>
    %c15 = arith.constant 15 : index
    %c0_59 = arith.constant 0 : index
    %c0_60 = arith.constant 0 : index
    %103 = vector.load %arg4[%c15, %c0_59, %c0_60] : memref<27x8x8xbf16, #tpu.memory_space<vmem>>, vector<1x8x8xbf16>
    %104 = vector.shape_cast %103 : vector<1x8x8xbf16> to vector<8x8xbf16>
    %cst_61 = arith.constant dense<0.000000e+00> : vector<8x512xf32>
    %105 = tpu.matmul %104, %102, %cst_61 {dimension_numbers = #tpu.dot_dimension_numbers<[1], [0], [0], [1], [0, 0, 1, 1], [], []>} : vector<8x8xbf16>, vector<8x512xbf16>, vector<8x512xf32> -> vector<8x512xf32>
    %106 = arith.addf %101, %105 : vector<8x512xf32>
    %107 = vector.extract_strided_slice %25 {offsets = [0, 121], sizes = [8, 512], strides = [1, 1]} : vector<8x768xbf16> to vector<8x512xbf16>
    %c16 = arith.constant 16 : index
    %c0_62 = arith.constant 0 : index
    %c0_63 = arith.constant 0 : index
    %108 = vector.load %arg4[%c16, %c0_62, %c0_63] : memref<27x8x8xbf16, #tpu.memory_space<vmem>>, vector<1x8x8xbf16>
    %109 = vector.shape_cast %108 : vector<1x8x8xbf16> to vector<8x8xbf16>
    %cst_64 = arith.constant dense<0.000000e+00> : vector<8x512xf32>
    %110 = tpu.matmul %109, %107, %cst_64 {dimension_numbers = #tpu.dot_dimension_numbers<[1], [0], [0], [1], [0, 0, 1, 1], [], []>} : vector<8x8xbf16>, vector<8x512xbf16>, vector<8x512xf32> -> vector<8x512xf32>
    %111 = arith.addf %106, %110 : vector<8x512xf32>
    %112 = vector.extract_strided_slice %25 {offsets = [0, 122], sizes = [8, 512], strides = [1, 1]} : vector<8x768xbf16> to vector<8x512xbf16>
    %c17 = arith.constant 17 : index
    %c0_65 = arith.constant 0 : index
    %c0_66 = arith.constant 0 : index
    %113 = vector.load %arg4[%c17, %c0_65, %c0_66] : memref<27x8x8xbf16, #tpu.memory_space<vmem>>, vector<1x8x8xbf16>
    %114 = vector.shape_cast %113 : vector<1x8x8xbf16> to vector<8x8xbf16>
    %cst_67 = arith.constant dense<0.000000e+00> : vector<8x512xf32>
    %115 = tpu.matmul %114, %112, %cst_67 {dimension_numbers = #tpu.dot_dimension_numbers<[1], [0], [0], [1], [0, 0, 1, 1], [], []>} : vector<8x8xbf16>, vector<8x512xbf16>, vector<8x512xf32> -> vector<8x512xf32>
    %116 = arith.addf %111, %115 : vector<8x512xf32>
    %117 = vector.extract_strided_slice %25 {offsets = [0, 200], sizes = [8, 512], strides = [1, 1]} : vector<8x768xbf16> to vector<8x512xbf16>
    %c18 = arith.constant 18 : index
    %c0_68 = arith.constant 0 : index
    %c0_69 = arith.constant 0 : index
    %118 = vector.load %arg4[%c18, %c0_68, %c0_69] : memref<27x8x8xbf16, #tpu.memory_space<vmem>>, vector<1x8x8xbf16>
    %119 = vector.shape_cast %118 : vector<1x8x8xbf16> to vector<8x8xbf16>
    %cst_70 = arith.constant dense<0.000000e+00> : vector<8x512xf32>
    %120 = tpu.matmul %119, %117, %cst_70 {dimension_numbers = #tpu.dot_dimension_numbers<[1], [0], [0], [1], [0, 0, 1, 1], [], []>} : vector<8x8xbf16>, vector<8x512xbf16>, vector<8x512xf32> -> vector<8x512xf32>
    %121 = arith.addf %116, %120 : vector<8x512xf32>
    %122 = vector.extract_strided_slice %25 {offsets = [0, 201], sizes = [8, 512], strides = [1, 1]} : vector<8x768xbf16> to vector<8x512xbf16>
    %c19 = arith.constant 19 : index
    %c0_71 = arith.constant 0 : index
    %c0_72 = arith.constant 0 : index
    %123 = vector.load %arg4[%c19, %c0_71, %c0_72] : memref<27x8x8xbf16, #tpu.memory_space<vmem>>, vector<1x8x8xbf16>
    %124 = vector.shape_cast %123 : vector<1x8x8xbf16> to vector<8x8xbf16>
    %cst_73 = arith.constant dense<0.000000e+00> : vector<8x512xf32>
    %125 = tpu.matmul %124, %122, %cst_73 {dimension_numbers = #tpu.dot_dimension_numbers<[1], [0], [0], [1], [0, 0, 1, 1], [], []>} : vector<8x8xbf16>, vector<8x512xbf16>, vector<8x512xf32> -> vector<8x512xf32>
    %126 = arith.addf %121, %125 : vector<8x512xf32>
    %127 = vector.extract_strided_slice %25 {offsets = [0, 202], sizes = [8, 512], strides = [1, 1]} : vector<8x768xbf16> to vector<8x512xbf16>
    %c20 = arith.constant 20 : index
    %c0_74 = arith.constant 0 : index
    %c0_75 = arith.constant 0 : index
    %128 = vector.load %arg4[%c20, %c0_74, %c0_75] : memref<27x8x8xbf16, #tpu.memory_space<vmem>>, vector<1x8x8xbf16>
    %129 = vector.shape_cast %128 : vector<1x8x8xbf16> to vector<8x8xbf16>
    %cst_76 = arith.constant dense<0.000000e+00> : vector<8x512xf32>
    %130 = tpu.matmul %129, %127, %cst_76 {dimension_numbers = #tpu.dot_dimension_numbers<[1], [0], [0], [1], [0, 0, 1, 1], [], []>} : vector<8x8xbf16>, vector<8x512xbf16>, vector<8x512xf32> -> vector<8x512xf32>
    %131 = arith.addf %126, %130 : vector<8x512xf32>
    %132 = vector.extract_strided_slice %25 {offsets = [0, 210], sizes = [8, 512], strides = [1, 1]} : vector<8x768xbf16> to vector<8x512xbf16>
    %c21 = arith.constant 21 : index
    %c0_77 = arith.constant 0 : index
    %c0_78 = arith.constant 0 : index
    %133 = vector.load %arg4[%c21, %c0_77, %c0_78] : memref<27x8x8xbf16, #tpu.memory_space<vmem>>, vector<1x8x8xbf16>
    %134 = vector.shape_cast %133 : vector<1x8x8xbf16> to vector<8x8xbf16>
    %cst_79 = arith.constant dense<0.000000e+00> : vector<8x512xf32>
    %135 = tpu.matmul %134, %132, %cst_79 {dimension_numbers = #tpu.dot_dimension_numbers<[1], [0], [0], [1], [0, 0, 1, 1], [], []>} : vector<8x8xbf16>, vector<8x512xbf16>, vector<8x512xf32> -> vector<8x512xf32>
    %136 = arith.addf %131, %135 : vector<8x512xf32>
    %137 = vector.extract_strided_slice %25 {offsets = [0, 211], sizes = [8, 512], strides = [1, 1]} : vector<8x768xbf16> to vector<8x512xbf16>
    %c22 = arith.constant 22 : index
    %c0_80 = arith.constant 0 : index
    %c0_81 = arith.constant 0 : index
    %138 = vector.load %arg4[%c22, %c0_80, %c0_81] : memref<27x8x8xbf16, #tpu.memory_space<vmem>>, vector<1x8x8xbf16>
    %139 = vector.shape_cast %138 : vector<1x8x8xbf16> to vector<8x8xbf16>
    %cst_82 = arith.constant dense<0.000000e+00> : vector<8x512xf32>
    %140 = tpu.matmul %139, %137, %cst_82 {dimension_numbers = #tpu.dot_dimension_numbers<[1], [0], [0], [1], [0, 0, 1, 1], [], []>} : vector<8x8xbf16>, vector<8x512xbf16>, vector<8x512xf32> -> vector<8x512xf32>
    %141 = arith.addf %136, %140 : vector<8x512xf32>
    %142 = vector.extract_strided_slice %25 {offsets = [0, 212], sizes = [8, 512], strides = [1, 1]} : vector<8x768xbf16> to vector<8x512xbf16>
    %c23 = arith.constant 23 : index
    %c0_83 = arith.constant 0 : index
    %c0_84 = arith.constant 0 : index
    %143 = vector.load %arg4[%c23, %c0_83, %c0_84] : memref<27x8x8xbf16, #tpu.memory_space<vmem>>, vector<1x8x8xbf16>
    %144 = vector.shape_cast %143 : vector<1x8x8xbf16> to vector<8x8xbf16>
    %cst_85 = arith.constant dense<0.000000e+00> : vector<8x512xf32>
    %145 = tpu.matmul %144, %142, %cst_85 {dimension_numbers = #tpu.dot_dimension_numbers<[1], [0], [0], [1], [0, 0, 1, 1], [], []>} : vector<8x8xbf16>, vector<8x512xbf16>, vector<8x512xf32> -> vector<8x512xf32>
    %146 = arith.addf %141, %145 : vector<8x512xf32>
    %147 = vector.extract_strided_slice %25 {offsets = [0, 220], sizes = [8, 512], strides = [1, 1]} : vector<8x768xbf16> to vector<8x512xbf16>
    %c24 = arith.constant 24 : index
    %c0_86 = arith.constant 0 : index
    %c0_87 = arith.constant 0 : index
    %148 = vector.load %arg4[%c24, %c0_86, %c0_87] : memref<27x8x8xbf16, #tpu.memory_space<vmem>>, vector<1x8x8xbf16>
    %149 = vector.shape_cast %148 : vector<1x8x8xbf16> to vector<8x8xbf16>
    %cst_88 = arith.constant dense<0.000000e+00> : vector<8x512xf32>
    %150 = tpu.matmul %149, %147, %cst_88 {dimension_numbers = #tpu.dot_dimension_numbers<[1], [0], [0], [1], [0, 0, 1, 1], [], []>} : vector<8x8xbf16>, vector<8x512xbf16>, vector<8x512xf32> -> vector<8x512xf32>
    %151 = arith.addf %146, %150 : vector<8x512xf32>
    %152 = vector.extract_strided_slice %25 {offsets = [0, 221], sizes = [8, 512], strides = [1, 1]} : vector<8x768xbf16> to vector<8x512xbf16>
    %c25 = arith.constant 25 : index
    %c0_89 = arith.constant 0 : index
    %c0_90 = arith.constant 0 : index
    %153 = vector.load %arg4[%c25, %c0_89, %c0_90] : memref<27x8x8xbf16, #tpu.memory_space<vmem>>, vector<1x8x8xbf16>
    %154 = vector.shape_cast %153 : vector<1x8x8xbf16> to vector<8x8xbf16>
    %cst_91 = arith.constant dense<0.000000e+00> : vector<8x512xf32>
    %155 = tpu.matmul %154, %152, %cst_91 {dimension_numbers = #tpu.dot_dimension_numbers<[1], [0], [0], [1], [0, 0, 1, 1], [], []>} : vector<8x8xbf16>, vector<8x512xbf16>, vector<8x512xf32> -> vector<8x512xf32>
    %156 = arith.addf %151, %155 : vector<8x512xf32>
    %157 = vector.extract_strided_slice %25 {offsets = [0, 222], sizes = [8, 512], strides = [1, 1]} : vector<8x768xbf16> to vector<8x512xbf16>
    %c26 = arith.constant 26 : index
    %c0_92 = arith.constant 0 : index
    %c0_93 = arith.constant 0 : index
    %158 = vector.load %arg4[%c26, %c0_92, %c0_93] : memref<27x8x8xbf16, #tpu.memory_space<vmem>>, vector<1x8x8xbf16>
    %159 = vector.shape_cast %158 : vector<1x8x8xbf16> to vector<8x8xbf16>
    %cst_94 = arith.constant dense<0.000000e+00> : vector<8x512xf32>
    %160 = tpu.matmul %159, %157, %cst_94 {dimension_numbers = #tpu.dot_dimension_numbers<[1], [0], [0], [1], [0, 0, 1, 1], [], []>} : vector<8x8xbf16>, vector<8x512xbf16>, vector<8x512xf32> -> vector<8x512xf32>
    %161 = arith.addf %156, %160 : vector<8x512xf32>
    %c0_95 = arith.constant 0 : index
    %c0_96 = arith.constant 0 : index
    %c0_97 = arith.constant 0 : index
    %162 = vector.load %arg5[%c0_95, %c0_96, %c0_97] : memref<1x8x512xf32, #tpu.memory_space<vmem>>, vector<1x8x512xf32>
    %163 = vector.shape_cast %162 : vector<1x8x512xf32> to vector<8x512xf32>
    %164 = vector.shape_cast %161 : vector<8x512xf32> to vector<1x8x512xf32>
    tpu.vector_store %arg5[%c0_95, %c0_96, %c0_97], %164 {strides = array<i32>} : memref<1x8x512xf32, #tpu.memory_space<vmem>>, vector<1x8x512xf32>,
    %c0_98 = arith.constant 0 : index
    %c0_99 = arith.constant 0 : index
    %165 = vector.load %arg2[%c0_98, %c0_99] : memref<1x512xf32, #tpu.memory_space<vmem>>, vector<1x512xf32>
    %166 = vector.broadcast %165 : vector<1x512xf32> to vector<8x512xf32>
    %167 = arith.mulf %161, %166 : vector<8x512xf32>
    %cst_100 = arith.constant dense<0.000000e+00> : vector<8xf32>
    %168 = vector.multi_reduction <add>, %167, %cst_100 [1] : vector<8x512xf32> to vector<8xf32>
    %169 = vector.shape_cast %168 : vector<8xf32> to vector<8x1xf32>
    %170 = arith.mulf %167, %161 : vector<8x512xf32>
    %cst_101 = arith.constant dense<0.000000e+00> : vector<8xf32>
    %171 = vector.multi_reduction <add>, %170, %cst_101 [1] : vector<8x512xf32> to vector<8xf32>
    %172 = vector.shape_cast %171 : vector<8xf32> to vector<8x1xf32>
    %c0_i32_102 = arith.constant 0 : i32
    %173 = arith.cmpi eq, %arg1, %c0_i32_102 : i32
    %174 = arith.extui %173 : i1 to i32
    %c0_i32_103 = arith.constant 0 : i32
    %175 = arith.cmpi ne, %174, %c0_i32_103 : i32
    scf.if %175 {
      %cst_110 = arith.constant 0.000000e+00 : f32
      %183 = vector.broadcast %cst_110 : f32 to vector<8x2xf32>
      %c0_111 = arith.constant 0 : index
      %c0_112 = arith.constant 0 : index
      %c0_113 = arith.constant 0 : index
      %184 = vector.load %arg6[%c0_111, %c0_112, %c0_113] : memref<1x8x2xf32, #tpu.memory_space<vmem>>, vector<1x8x2xf32>
      %185 = vector.shape_cast %184 : vector<1x8x2xf32> to vector<8x2xf32>
      %186 = vector.shape_cast %183 : vector<8x2xf32> to vector<1x8x2xf32>
      tpu.vector_store %arg6[%c0_111, %c0_112, %c0_113], %186 {strides = array<i32>} : memref<1x8x2xf32, #tpu.memory_space<vmem>>, vector<1x8x2xf32>,
    } else {
    }
    %c0_104 = arith.constant 0 : index
    %c0_105 = arith.constant 0 : index
    %c0_106 = arith.constant 0 : index
    %176 = vector.load %arg6[%c0_104, %c0_105, %c0_106] : memref<1x8x2xf32, #tpu.memory_space<vmem>>, vector<1x8x2xf32>
    %177 = vector.shape_cast %176 : vector<1x8x2xf32> to vector<8x2xf32>
    %178 = tpu.concatenate %169, %172 in 1 : vector<8x1xf32>, vector<8x1xf32> -> vector<8x2xf32>
    %179 = arith.addf %177, %178 : vector<8x2xf32>
    %c0_107 = arith.constant 0 : index
    %c0_108 = arith.constant 0 : index
    %c0_109 = arith.constant 0 : index
    %180 = vector.load %arg6[%c0_107, %c0_108, %c0_109] : memref<1x8x2xf32, #tpu.memory_space<vmem>>, vector<1x8x2xf32>
    %181 = vector.shape_cast %180 : vector<1x8x2xf32> to vector<8x2xf32>
    %182 = vector.shape_cast %179 : vector<8x2xf32> to vector<1x8x2xf32>
    tpu.vector_store %arg6[%c0_107, %c0_108, %c0_109], %182 {strides = array<i32>} : memref<1x8x2xf32, #tpu.memory_space<vmem>>, vector<1x8x2xf32>,
    return
  }
  func.func @transform_0(%arg0: i32, %arg1: i32) -> (i32, i32) {
    %c0_i32 = arith.constant 0 : i32
    %c0_i32_0 = arith.constant 0 : i32
    return %c0_i32, %arg1 : i32, i32
  }
  func.func @transform_2(%arg0: i32, %arg1: i32) -> (i32, i32, i32) {
    %c0_i32 = arith.constant 0 : i32
    %c0_i32_0 = arith.constant 0 : i32
    %c0_i32_1 = arith.constant 0 : i32
    %c0_i32_2 = arith.constant 0 : i32
    return %c0_i32, %c0_i32_0, %c0_i32_1 : i32, i32, i32
  }
  func.func @transform_3(%arg0: i32, %arg1: i32) -> (i32, i32, i32) {
    %c0_i32 = arith.constant 0 : i32
    %c0_i32_0 = arith.constant 0 : i32
    return %arg0, %c0_i32, %arg1 : i32, i32, i32
  }
  func.func @transform_4(%arg0: i32, %arg1: i32) -> (i32, i32, i32) {
    %c0_i32 = arith.constant 0 : i32
    %c0_i32_0 = arith.constant 0 : i32
    %c0_i32_1 = arith.constant 0 : i32
    return %arg0, %c0_i32, %c0_i32_0 : i32, i32, i32
  }
}

module attributes {stable_mosaic.version = 11 : i64} {
  func.func @_norm_silu_kernel(%arg0: i32, %arg1: i32, %arg2: memref<1x8x512xf32, #tpu.memory_space<vmem>>, %arg3: memref<1x8x1xf32, #tpu.memory_space<vmem>>, %arg4: memref<1x8x1xf32, #tpu.memory_space<vmem>>, %arg5: memref<1x512xf32, #tpu.memory_space<vmem>>, %arg6: memref<1x8x512xbf16, #tpu.memory_space<vmem>>) attributes {dimension_semantics = [#tpu.dimension_semantics<parallel>, #tpu.dimension_semantics<parallel>], iteration_bounds = array<i64: 2, 2>, scalar_prefetch = 0 : i64, scratch_operands = 0 : i64, tpu.core_type = #tpu.core_type<tc>, window_params = [{transform_indices = @transform_0, window_bounds = array<i64: 1, 8, 512>}, {transform_indices = @transform_1, window_bounds = array<i64: 1, 8, 1>}, {transform_indices = @transform_2, window_bounds = array<i64: 1, 8, 1>}, {transform_indices = @transform_3, window_bounds = array<i64: 1, 512>}, {transform_indices = @transform_4, window_bounds = array<i64: 1, 8, 512>}]} {
    %c0 = arith.constant 0 : index
    %c0_0 = arith.constant 0 : index
    %c0_1 = arith.constant 0 : index
    %0 = vector.load %arg2[%c0, %c0_0, %c0_1] : memref<1x8x512xf32, #tpu.memory_space<vmem>>, vector<1x8x512xf32>
    %1 = vector.shape_cast %0 : vector<1x8x512xf32> to vector<8x512xf32>
    %c0_2 = arith.constant 0 : index
    %c0_3 = arith.constant 0 : index
    %c0_4 = arith.constant 0 : index
    %2 = vector.load %arg3[%c0_2, %c0_3, %c0_4] : memref<1x8x1xf32, #tpu.memory_space<vmem>>, vector<1x8x1xf32>
    %3 = vector.shape_cast %2 : vector<1x8x1xf32> to vector<8x1xf32>
    %4 = vector.broadcast %3 : vector<8x1xf32> to vector<8x512xf32>
    %5 = arith.subf %1, %4 : vector<8x512xf32>
    %c0_5 = arith.constant 0 : index
    %c0_6 = arith.constant 0 : index
    %c0_7 = arith.constant 0 : index
    %6 = vector.load %arg4[%c0_5, %c0_6, %c0_7] : memref<1x8x1xf32, #tpu.memory_space<vmem>>, vector<1x8x1xf32>
    %7 = vector.shape_cast %6 : vector<1x8x1xf32> to vector<8x1xf32>
    %8 = vector.broadcast %7 : vector<8x1xf32> to vector<8x512xf32>
    %9 = arith.mulf %5, %8 : vector<8x512xf32>
    %10 = arith.negf %9 : vector<8x512xf32>
    %11 = math.exp %10 : vector<8x512xf32>
    %cst = arith.constant 1.000000e+00 : f32
    %12 = vector.broadcast %cst : f32 to vector<8x512xf32>
    %13 = arith.addf %12, %11 : vector<8x512xf32>
    %14 = arith.divf %12, %13 : vector<8x512xf32>
    %15 = arith.mulf %9, %14 : vector<8x512xf32>
    %c0_8 = arith.constant 0 : index
    %c0_9 = arith.constant 0 : index
    %16 = vector.load %arg5[%c0_8, %c0_9] : memref<1x512xf32, #tpu.memory_space<vmem>>, vector<1x512xf32>
    %17 = vector.broadcast %16 : vector<1x512xf32> to vector<8x512xf32>
    %18 = arith.mulf %15, %17 : vector<8x512xf32>
    %19 = arith.truncf %18 : vector<8x512xf32> to vector<8x512xbf16>
    %c0_10 = arith.constant 0 : index
    %c0_11 = arith.constant 0 : index
    %c0_12 = arith.constant 0 : index
    %20 = vector.load %arg6[%c0_10, %c0_11, %c0_12] : memref<1x8x512xbf16, #tpu.memory_space<vmem>>, vector<1x8x512xbf16>
    %21 = vector.shape_cast %20 : vector<1x8x512xbf16> to vector<8x512xbf16>
    %22 = vector.shape_cast %19 : vector<8x512xbf16> to vector<1x8x512xbf16>
    tpu.vector_store %arg6[%c0_10, %c0_11, %c0_12], %22 {strides = array<i32>} : memref<1x8x512xbf16, #tpu.memory_space<vmem>>, vector<1x8x512xbf16>,
    return
  }
  func.func @transform_0(%arg0: i32, %arg1: i32) -> (i32, i32, i32) {
    %c0_i32 = arith.constant 0 : i32
    %c0_i32_0 = arith.constant 0 : i32
    return %arg0, %c0_i32, %arg1 : i32, i32, i32
  }
  func.func @transform_1(%arg0: i32, %arg1: i32) -> (i32, i32, i32) {
    %c0_i32 = arith.constant 0 : i32
    %c0_i32_0 = arith.constant 0 : i32
    %c0_i32_1 = arith.constant 0 : i32
    return %arg0, %c0_i32, %c0_i32_0 : i32, i32, i32
  }
  func.func @transform_2(%arg0: i32, %arg1: i32) -> (i32, i32, i32) {
    %c0_i32 = arith.constant 0 : i32
    %c0_i32_0 = arith.constant 0 : i32
    %c0_i32_1 = arith.constant 0 : i32
    return %arg0, %c0_i32, %c0_i32_0 : i32, i32, i32
  }
  func.func @transform_3(%arg0: i32, %arg1: i32) -> (i32, i32) {
    %c0_i32 = arith.constant 0 : i32
    %c0_i32_0 = arith.constant 0 : i32
    return %c0_i32, %arg1 : i32, i32
  }
  func.func @transform_4(%arg0: i32, %arg1: i32) -> (i32, i32, i32) {
    %c0_i32 = arith.constant 0 : i32
    %c0_i32_0 = arith.constant 0 : i32
    return %arg0, %c0_i32, %arg1 : i32, i32, i32
  }
}

</mosaic_0001>

<bundles_post_ra>
// kernel: _lambda_.5
= control target key start
LH: loop header
LB: loop body
LE: loop exit
PB: predicated region body
PF: predicated region fallthrough
CT: control target
= control target key end

     0   :  { %s710_s12 = smov 0   ;;  %s712_s13 = smov 0   ;;  %s806_s0 = inlined_call_operand.vmem [shape: bf16[2,108,512], index: 0, kind: input, shape index: {}]   ;;  %s807_s1 = inlined_call_operand.vmem [shape: bf16[8,108], index: 1, kind: input, shape index: {}]   ;;  %s808_s2 = inlined_call_operand.vmem [shape: f32[8,1], index: 2, kind: input, shape index: {}]   ;;  %s809_s3 = inlined_call_operand.vmem [shape: f32[2,8,512], index: 3, kind: output, shape index: {}]  }
   0x1   :  { %s714_s14 = smov 0   ;;  %s716_s15 = smov 0  }
   0x2   :  { %s718_s16 = smov 0   ;;  %s720_s17 = smov 0  }
   0x3   :  { %s722_s18 = smov 0  }
   0x4 LB: > { %s22_s19 = sadd.s32 1, %s679_s16  ;;  %s25_s20 = sadd.s32 1, %s683_s17  ;;  %s687_s18 = sphi %s722_s18, %s13_s18   ;;  %s683_s17 = sphi %s720_s17, %s815_s17   ;;  %s679_s16 = sphi %s718_s16, %s814_s16   ;;  %s675_s15 = sphi %s716_s15, %s813_s15   ;;  %s671_s14 = sphi %s714_s14, %s812_s14   ;;  %s667_s13 = sphi %s712_s13, %s811_s13   ;;  %s663_s12 = sphi %s710_s12, %s810_s12  }
   0x5   : > { %p23_p0 = scmp.ge.s32.totalorder %s22_s19, 2  ;;  %p41_p1 = scmp.ne.s32.totalorder %s667_s13, %s663_s12 }
   0x6   : > { %p42_p2 = scmp.eq.s32.totalorder %s687_s18, 0  ;;  %s34_s24 = sadd.s32 1, %s667_s13 }
   0x7   : > { %s817_s19 = smov (%p23_p0, %s22_s19), 0  ;;  %s819_s20 = smov (!%p23_p0, %s25_s20), %s683_s17 }
   0x8   : > { %p43_p3 = por %p42_p2, %p41_p1  ;;  %p27_p4 = scmp.ge.s32.totalorder %s819_s20, 2 }
   0x9   : > { %s30_s21 = ssub.s32 %s679_s16, %s817_s19  ;;  %p526_p6 = scmp.ge.s32.totalorder %s687_s18, 4 }
   0xa   : > { %s821_s20 = smov (%p27_p4, %s819_s20), 0 }
   0xb   : > { %s29_s22 = ssub.s32 %s683_s17, %s821_s20  ;;  %143 = sbr.rel (%p526_p6) target bundleno = 33 (0x21), region = 24 }
   0xc   : > { %s31_s23 = sor.u32 %s30_s21, %s29_s22 }
   0xd   : > { %p32_p5 = scmp.eq.s32.totalorder %s31_s23, 0 }
   0xf   : > { %s761_s25 = scalar_select %p32_p5, %s667_s13, %s34_s24  }
  0x12   : > { %146 = sbr.rel (!%p43_p3) target bundleno = 33 (0x21), region = 28  ;;  %s148_s26 = sand.u32 (%p43_p3), 1, %s667_s13  }
  0x13   : > { %s551_s27 = smul.u32 (%p43_p3), 112, %s148_s26  ;;  %s527_s28 = sshll.u32 (%p43_p3), %s679_s16, 1 }
  0x14   : > { %s552_s29 = smul.u32 (%p43_p3), 56, %s683_s17 }
  0x15   : > { %s150_s8 = scalar_lea.vmem (%p43_p3), [#allocation2], %s551_s27 }
  0x16   : > { %s153_s30 = sadd.s32 (%p43_p3), %s552_s29, %s527_s28 }
  0x17   : > { %s528_s4 = sshll.u32 (%p43_p3), %s153_s30, 2 }
  0x18   : > { %s155_s7 = scalar_lea.vmem (%p43_p3), %s806_s0, %s528_s4 }
  0x19   : > { %v209_v0 = vld [vmem:[%s155_s7] sm:$0xff]  ;;  %v211_v1 = vld [vmem:[%s155_s7 + $0x10] sm:$0xff] }
  0x1a   : > { %v213_v2 = vld [vmem:[%s155_s7 + $0x20] sm:$0xff]  ;;  %210 = vst [vmem:[%s150_s8] sm:$0xff] %v209_v0  ;;  %212 = vst [vmem:[%s150_s8 + $0x8] sm:$0xff] %v211_v1  ;;  %v215_v3 = vld [vmem:[%s155_s7 + $0x30] sm:$0xff] }
  0x1b   : > { %214 = vst [vmem:[%s150_s8 + $0x10] sm:$0xff] %v213_v2  ;;  %v217_v4 = vld [vmem:[%s155_s7 + $0x40] sm:$0xff]  ;;  %v219_v5 = vld [vmem:[%s155_s7 + $0x50] sm:$0xff]  ;;  %216 = vst [vmem:[%s150_s8 + $0x18] sm:$0xff] %v215_v3 }
  0x1c   : > { %218 = vst [vmem:[%s150_s8 + $0x20] sm:$0xff] %v217_v4  ;;  %220 = vst [vmem:[%s150_s8 + $0x28] sm:$0xff] %v219_v5  ;;  %v221_v6 = vld [vmem:[%s155_s7 + $0x60] sm:$0xff]  ;;  %v223_v7 = vld [vmem:[%s155_s7 + $0x70] sm:$0xff] }
  0x1d   : > { %v225_v8 = vld [vmem:[%s155_s7 + $0x80] sm:$0xff]  ;;  %222 = vst [vmem:[%s150_s8 + $0x30] sm:$0xff] %v221_v6  ;;  %224 = vst [vmem:[%s150_s8 + $0x38] sm:$0xff] %v223_v7  ;;  %v227_v9 = vld [vmem:[%s155_s7 + $0x90] sm:$0xff] }
  0x1e   : > { %226 = vst [vmem:[%s150_s8 + $0x40] sm:$0xff] %v225_v8  ;;  %v229_v10 = vld [vmem:[%s155_s7 + $0xa0] sm:$0xff]  ;;  %v231_v11 = vld [vmem:[%s155_s7 + $0xb0] sm:$0xff]  ;;  %228 = vst [vmem:[%s150_s8 + $0x48] sm:$0xff] %v227_v9 }
  0x1f   : > { %230 = vst [vmem:[%s150_s8 + $0x50] sm:$0xff] %v229_v10  ;;  %232 = vst [vmem:[%s150_s8 + $0x58] sm:$0xff] %v231_v11  ;;  %v233_v12 = vld [vmem:[%s155_s7 + $0xc0] sm:$0xff]  ;;  %v235_v13 = vld [vmem:[%s155_s7 + $0xd0] sm:$0xff] }
  0x20   : > { %234 = vst [vmem:[%s150_s8 + $0x60] sm:$0xff] %v233_v12  ;;  %236 = vst [vmem:[%s150_s8 + $0x68] sm:$0xff] %v235_v13 }
  0x21 PF: > { %p529_p7 = scmp.ge.s32.totalorder %s687_s18, 1  ;;  %p241_p8 = scmp.lt.s32.totalorder %s687_s18, 5 }
  0x23   : > { %p242_p9 = pnand %p529_p7, %p241_p8 }
  0x24   : > { %s248_s9 = sand.u32 (!%p242_p9), 1, %s663_s12   ;;  %v689_v14 = vmov (!%p242_p9), 0   ;;  %v302_v15 = vld [vmem:[%s808_s2] sm:$0xff] (!%p242_p9)  ;;  %vm380_vm0 = vcmask (!%p242_p9), 1045504   ;;  %vm376_vm1 = vcmask (!%p242_p9), 883712   ;;  %s530_s24 = sshll.u32 (!%p242_p9), %s671_s14, 1 }
  0x25   : > { %245 = sbr.rel (%p242_p9) target bundleno = 286 (0x11e), region = 66  ;;  %419 = vmatprep.mubr.bf16.mxu0 (!%p242_p9), %v689_v14  ;;  %611 = vset.pattern.permute.xlu0 (!%p242_p9), %v689_v14  ;;  %v287_v31 = vld [vmem:[%s807_s1] sm:$0xf] (!%p242_p9)  ;;  %p277_p10 = scmp.lt.s32.totalorder (!%p242_p9), %s675_s15, 1 }
  0x26   : > { %s553_s10 = smul.u32 (!%p242_p9), 112, %s248_s9  ;;  %305 = vperm.xlu0 (!%p242_p9), %611, %v302_v15   ;;  %p279_p11 = scmp.lt.s32.totalorder (!%p242_p9), %s530_s24, 3 }
  0x28   : > { %s250_s22 = scalar_lea.vmem (!%p242_p9), [#allocation2], %s553_s10 }
  0x29   : > { %v612_v16 = vld [vmem:[%s250_s22 + $0x4] ss:$8 sps:$4 sm:$0xff] (!%p242_p9)   ;;  %v614_v17 = vld [vmem:[%s250_s22] ss:$8 sps:$4 sm:$0xff] (!%p242_p9)   ;;  %v615_v18 = vld [vmem:[%s250_s22 + $0x14] ss:$8 sps:$4 sm:$0xff] (!%p242_p9)  }
  0x2a   : > { %387 = vmatprep.subr.bf16.mxu0 (!%p242_p9), %v612_v16  ;;  %v617_v19 = vld [vmem:[%s250_s22 + $0x10] ss:$8 sps:$4 sm:$0xff] (!%p242_p9)   ;;  %v618_v20 = vld [vmem:[%s250_s22 + $0x24] ss:$8 sps:$4 sm:$0xff] (!%p242_p9)   ;;  %v620_v21 = vld [vmem:[%s250_s22 + $0x20] ss:$8 sps:$4 sm:$0xff] (!%p242_p9)  }
  0x2b   : > { %388 = vmatpush1.bf16.msra.mxu0 (!%p242_p9), %v614_v17  ;;  %v621_v22 = vld [vmem:[%s250_s22 + $0x34] ss:$8 sps:$4 sm:$0xff] (!%p242_p9)   ;;  %v623_v23 = vld [vmem:[%s250_s22 + $0x30] ss:$8 sps:$4 sm:$0xff] (!%p242_p9)   ;;  %v624_v24 = vld [vmem:[%s250_s22 + $0x44] ss:$8 sps:$4 sm:$0xff] (!%p242_p9)  }
  0x2c   : > { %389 = vmatprep.subr.bf16.mxu0 %v615_v18  ;;  %v626_v25 = vld [vmem:[%s250_s22 + $0x40] ss:$8 sps:$4 sm:$0xff]   ;;  %v627_v26 = vld [vmem:[%s250_s22 + $0x54] ss:$8 sps:$4 sm:$0xff]   ;;  %v629_v27 = vld [vmem:[%s250_s22 + $0x50] ss:$8 sps:$4 sm:$0xff]  }
  0x2d   : > { %v630_v28 = vld [vmem:[%s250_s22 + $0x64] ss:$8 sps:$4 sm:$0x3f]   ;;  %v632_v29 = vld [vmem:[%s250_s22 + $0x60] ss:$8 sps:$4 sm:$0x3f]  }
  0x2e   : > { %v382_v30 = vsel %vm380_vm0, %v632_v29, 0  ;;  %s823_s15 = smov (!%p277_p10, %s675_s15), 1  ;;  %s825_s24 = smov (!%p279_p11, %s530_s24), 3 }
  0x2f   : > { %390 = vmatpush1.bf16.msra.mxu0 %v617_v19  ;;  %s531_s26 = sshll.u32 %s823_s15, 2 }
  0x30   : > { %391 = vmatprep.subr.bf16.mxu0 %v618_v20  ;;  %s282_s27 = sadd.s32 %s531_s26, %s825_s24 }
  0x31   : > { %s532_s28 = sshll.u32 %s282_s27, 3 }
  0x32   : > { %s284_s4 = scalar_lea.vmem %s809_s3, %s532_s28 }
  0x33   : > { %392 = vmatpush1.bf16.msra.mxu0 %v620_v21 }
  0x34   : > { %393 = vmatprep.subr.bf16.mxu0 %v621_v22 }
  0x37   : > { %394 = vmatpush1.bf16.msra.mxu0 %v623_v23 }
  0x38   : > { %395 = vmatprep.subr.bf16.mxu0 %v624_v24 }
  0x3b   : > { %396 = vmatpush1.bf16.msra.mxu0 %v626_v25 }
  0x3c   : > { %397 = vmatprep.subr.bf16.mxu0 %v627_v26 }
  0x3f   : > { %398 = vmatpush1.bf16.msra.mxu0 %v629_v27 }
  0x40   : > { %547 = vmatprep.subr.msk.bf16.mxu0 %vm380_vm0, %v630_v28 }
  0x43   : > { %400 = vmatpush1.bf16.msra.mxu0 %v382_v30 }
  0x46   : > { %548 = vmatmul.mubr.msk.bf16.vlgmr.msra.gmra.mrb[0].mxu0 %vm376_vm1, %v287_v31 }
  0xa5   : > { %v306_v32 = vpop.permute.xlu0 %305 }
 0x119   : > { %v421_v33 = vpop.f32.mrb[0].mxu0 }
 0x11a   : > { %v422_v34 = vadd.f32 %v421_v33, %v306_v32  ;;  %v423_v35 = vpop.f32.mrb[1].mxu0 }
 0x11b   : > { %v424_v36 = vadd.f32 %v423_v35, %v306_v32  ;;  %v425_v37 = vpop.f32.mrb[2].mxu0 }
 0x11c   : > { %428 = vst [vmem:[%s284_s4] sm:$0xff] %v422_v34  ;;  %v426_v38 = vpop.f32.mrb[3].mxu0 }
 0x11d   : > { %429 = vst [vmem:[%s284_s4 + $0x8] sm:$0xff] %v424_v36 }
 0x11e PF: > { %s13_s18 = sadd.s32 1, %s687_s18   ;;  %s810_s12 = smov %s667_s13 }
 0x11f   : > { %p10_p12 = scmp.ge.s32.totalorder %s13_s18, 6   ;;  %s811_s13 = smov %s761_s25 }
 0x120   : > { %s812_s14 = smov %s679_s16  ;;  %s813_s15 = smov %s683_s17 }
 0x121   : > { %s814_s16 = smov %s817_s19  ;;  %s815_s17 = smov %s821_s20 }
 0x122   :  { %12 = sbr.rel (!%p10_p12) target bundleno = 4 (0x4), region = 105 }

// kernel: _lambda_.6
= control target key start
LH: loop header
LB: loop body
LE: loop exit
PB: predicated region body
PF: predicated region fallthrough
CT: control target
= control target key end

     0   :  { %s4294_s15 = smov 0   ;;  %s4296_s16 = smov 0   ;;  %s4976_s0 = inlined_call_operand.vmem [shape: f32[1,1024], index: 0, kind: input, shape index: {}]   ;;  %s4977_s1 = inlined_call_operand.vmem [shape: bf16[2,8,1280], index: 1, kind: input, shape index: {}]   ;;  %s4978_s2 = inlined_call_operand.vmem [shape: bf16[27,8,8], index: 2, kind: input, shape index: {}]   ;;  %s4979_s3 = inlined_call_operand.vmem [shape: f32[2,8,1024], index: 3, kind: output, shape index: {0}]   ;;  %s4980_s4 = inlined_call_operand.vmem [shape: f32[2,8,2], index: 4, kind: output, shape index: {1}]  }
   0x1   :  { %s4298_s17 = smov 0   ;;  %s4300_s18 = smov 0  }
   0x2   :  { %s4302_s19 = smov 0  }
   0x3 LB: > { %s24_s20 = sadd.s32 1, %s4231_s17  ;;  %s27_s21 = sadd.s32 1, %s4235_s18  ;;  %s4239_s19 = sphi %s4302_s19, %s15_s19   ;;  %s4235_s18 = sphi %s4300_s18, %s4984_s18   ;;  %s4231_s17 = sphi %s4298_s17, %s4983_s17   ;;  %s4227_s16 = sphi %s4296_s16, %s4982_s16   ;;  %s4223_s15 = sphi %s4294_s15, %s4981_s15  }
   0x4   : > { %p25_p0 = scmp.ge.s32.totalorder %s24_s20, 2  ;;  %p3749_p1 = scmp.ge.s32.totalorder %s4239_s19, 1 }
   0x5   : > { %p155_p2 = scmp.lt.s32.totalorder %s4239_s19, 5 }
   0x6   : > { %s4986_s20 = smov (%p25_p0, %s24_s20), 0  ;;  %s4988_s21 = smov (!%p25_p0, %s27_s21), %s4235_s18 }
   0x7   : > { %p156_p3 = pnand %p3749_p1, %p155_p2  ;;  %p29_p4 = scmp.ge.s32.totalorder %s4988_s21, 2 }
   0x8   : > { %s3750_s22 = sshll.u32 (!%p156_p3), %s4223_s15, 2  ;;  %p192_p5 = scmp.lt.s32.totalorder (!%p156_p3), %s4227_s16, 1 }
   0x9   : > { %s4990_s21 = smov (%p29_p4, %s4988_s21), 0  ;;  %159 = sbr.rel (%p156_p3) target bundleno = 862 (0x35e), region = 28 }
   0xa   : > { %p187_p6 = scmp.lt.s32.totalorder (!%p156_p3), %s3750_s22, 7  ;;  %p206_p7 = scmp.lt.s32.totalorder (!%p156_p3), %s4223_s15, 0 }
   0xb   : > { %s207_s25 = ssub.s32 (!%p156_p3), 0, %s4223_s15  ;;  %p3758_p9 = scmp.ne.s32.totalorder (!%p156_p3), %s4223_s15, 0 }
   0xc   : > { %s3755_s11 = smin.u32 (!%p156_p3), %s4223_s15, %s207_s25 }
   0xd   : > { %s209_s12 = sand.u32 (!%p156_p3), 1, %s3755_s11  }
   0xe   : > { %s210_s13 = ssub.s32 (!%p156_p3), 0, %s209_s12 }
  0x10   : > { %s193_s23 = scalar_select %p192_p5, %s4227_s16, 1 }
  0x11   : > { %s4992_s22 = smov (!%p187_p6, %s3750_s22), 7  ;;  %s4994_s13 = smov (!%p206_p7, %s210_s13), %s209_s12 }
  0x12   : > { %s3752_s24 = sshll.u32 %s193_s23, 3  ;;  %s189_s28 = scalar_lea.vmem %s4976_s0, %s4992_s22 }
  0x13   : > { %s197_s29 = sadd.s32 %s3752_s24, %s4992_s22  ;;  %s4343_s7 = scalar_lea.vmem %s4980_s4, %s3752_s24 }
  0x14   : > { %s3753_s30 = sshll.u32 %s197_s29, 3  ;;  %p3757_p8 = scmp.lt.s32.totalorder %s4994_s13, 0 }
  0x15   : > { %s4348_s10 = scalar_lea.vmem %s4979_s3, %s3753_s30  ;;  %s216_s14 = sadd.s32 2, %s4994_s13 }
  0x16   : > { %s4996_s14 = smov (!%p3757_p8, %s216_s14), %s4994_s13  ;;  %221 = sbr.rel (%p3758_p9) target bundleno = 32 (0x20), region = 32 }
  0x17   : > { %s3759_s23 = sshll.u32 (!%p3758_p9), %s4223_s15, 9  ;;  %s225_s24 = smul.u32 (!%p3758_p9), 10, %s4227_s16 }
  0x18   : > { %s223_s26 = sshra.s32 (!%p3758_p9), %s3759_s23, 7  ;;  %s3912_s25 = smul.u32 (!%p3758_p9), 24, %s4996_s14 }
  0x19   : > { %s226_s27 = sadd.s32 (!%p3758_p9), %s225_s24, %s223_s26  ;;  %s232_s9 = scalar_lea.sflag (!%p3758_p9), [#allocation3], %s4996_s14 }
  0x1a   : > { %s3760_s29 = sshll.u32 (!%p3758_p9), %s226_s27, 2  ;;  %s231_s8 = scalar_lea.vmem (!%p3758_p9), [#allocation2], %s3912_s25 }
  0x1b   : > { %s228_s6 = scalar_lea.vmem (!%p3758_p9), %s4977_s1, %s3760_s29 }
  0x1c   : > { %v265_v0 = vld [vmem:[%s228_s6] sm:$0xff] (!%p3758_p9)  ;;  %v267_v1 = vld [vmem:[%s228_s6 + $0x8] sm:$0xff] (!%p3758_p9)  ;;  %v269_v2 = vld [vmem:[%s228_s6 + $0x10] sm:$0xff] (!%p3758_p9) }
  0x1d   : > { %266 = vst [vmem:[%s231_s8] sm:$0xff] %v265_v0  ;;  %268 = vst [vmem:[%s231_s8 + $0x8] sm:$0xff] %v267_v1 }
  0x1e   : > { %270 = vst [vmem:[%s231_s8 + $0x10] sm:$0xff] %v269_v2 }
  0x1f   : > { %278 = vsyncadd %s232_s9, 384 }
  0x20 PF: > { %s279_s11 = sadd.s32 1, %s4223_s15 }
  0x21   : > { %p3762_p10 = scmp.ge.s32.totalorder %s279_s11, 2 }
  0x22   : > { %s284_s12 = ssub.s32 (!%p3762_p10), 1, %s4996_s14  ;;  %s3913_s13 = sshll.u32 (!%p3762_p10), %s4223_s15, 9 }
  0x23   : > { %283 = sbr.rel (%p3762_p10) target bundleno = 45 (0x2d), region = 70  ;;  %s3914_s23 = sadd.s32 (!%p3762_p10), 512, %s3913_s13 }
  0x24   : > { %s288_s24 = smul.u32 (!%p3762_p10), 10, %s4227_s16  ;;  %s286_s26 = sshra.s32 (!%p3762_p10), %s3914_s23, 7 }
  0x25   : > { %s3915_s27 = smul.u32 (!%p3762_p10), 24, %s284_s12  ;;  %s295_s9 = scalar_lea.sflag (!%p3762_p10), [#allocation3], %s284_s12 }
  0x26   : > { %s289_s25 = sadd.s32 (!%p3762_p10), %s288_s24, %s286_s26 }
  0x27   : > { %s3764_s29 = sshll.u32 (!%p3762_p10), %s289_s25, 2  ;;  %s294_s8 = scalar_lea.vmem (!%p3762_p10), [#allocation2], %s3915_s27 }
  0x28   : > { %s291_s6 = scalar_lea.vmem (!%p3762_p10), %s4977_s1, %s3764_s29 }
  0x29   : > { %v328_v3 = vld [vmem:[%s291_s6] sm:$0xff] (!%p3762_p10)  ;;  %v330_v4 = vld [vmem:[%s291_s6 + $0x8] sm:$0xff] (!%p3762_p10)  ;;  %v332_v5 = vld [vmem:[%s291_s6 + $0x10] sm:$0xff] (!%p3762_p10) }
  0x2a   : > { %329 = vst [vmem:[%s294_s8] sm:$0xff] %v328_v3  ;;  %331 = vst [vmem:[%s294_s8 + $0x8] sm:$0xff] %v330_v4 }
  0x2b   : > { %333 = vst [vmem:[%s294_s8 + $0x10] sm:$0xff] %v332_v5 }
  0x2c   : > { %341 = vsyncadd %s295_s9, 384 }
  0x2d PF: > { %s3916_s16 = smul.u32 24, %s4996_s14  ;;  %s345_s13 = scalar_lea.sflag [#allocation3], %s4996_s14 }
  0x2f   : > { %s344_s11 = scalar_lea.vmem [#allocation2], %s3916_s16 }
  0x30   : > { %4219 = dma.done.wait %s345_s13, 384 }
  0x31   : > { %4220 = vsyncadd %s345_s13, 4294966912  ;;  %v4241_v6 = vmov 0   ;;  %s4242_s12 = smov 127   ;;  %s4243_s14 = smov 126   ;;  %vm379_vm0 = vcmask 1039360   ;;  %vm388_vm1 = vcmask 1043456  }
  0x32   : > { %433 = vmatprep.mubr.bf16.mxu0 %v4241_v6  ;;  %474 = vmatprep.mubr.bf16.mxu1 %v4241_v6  ;;  %s4244_s23 = smov 118   ;;  %s4245_s24 = smov 117   ;;  %v3767_v22 = vld [vmem:[%s4978_s2 + $0x4] sm:$0xf]  ;;  %vm384_vm2 = vcmask 64512   ;;  %vm592_vm3 = vcmask 1031168  }
  0x33   : > { %s4246_s26 = smov 116   ;;  %s4247_s27 = smov 108   ;;  %v353_v37 = vld [vmem:[%s4978_s2] sm:$0xf]  ;;  %vm710_vm4 = vcmask 965632   ;;  %vm828_vm5 = vcmask 957440  }
  0x34   : > { %v351_v7 = vld [vmem:[%s344_s11 + $0x8] sm:$0xff]  ;;  %v350_v8 = vld [vmem:[%s344_s11] sm:$0xff]  ;;  %v4384_v13 = vld [vmem:[%s344_s11 + $0x10] sm:$0xff]  ;;  %s4248_s25 = smov 107   ;;  %s4249_s29 = smov 106   ;;  %vm946_vm6 = vcmask 949248  }
  0x35   : > { %v4374_v9 = vcombine.low %v351_v7, %v351_v7  ;;  %v4376_v10 = vcombine.low %v350_v8, %v350_v8  ;;  %v4379_v11 = vcombine.high %v350_v8, %v350_v8  ;;  %v4382_v12 = vcombine.high %v351_v7, %v351_v7  ;;  %s4250_s30 = smov 28   ;;  %s4251_s5 = smov 27   ;;  %v3781_v50 = vld [vmem:[%s4978_s2 + $0x8] sm:$0xf]  ;;  %v3786_v63 = vld [vmem:[%s4978_s2 + $0xc] sm:$0xf] }
  0x36   : > { %v4390_v14 = vcombine.low %v4384_v13, %v4384_v13  ;;  %s4252_s6 = smov 26   ;;  %s4253_s8 = smov 18   ;;  %vm1064_vm7 = vcmask 883712   ;;  %vm1182_vm8 = vcmask 875520   ;;  %vm1300_vm9 = vcmask 867328  }
  0x37   : > { %373 = vrot.lane.b32.xlu1 %v4374_v9, %s4242_s12  ;;  %369 = vrot.lane.b32.xlu0 %v4376_v10, %s4242_s12  ;;  %s4254_s9 = smov 17   ;;  %v487_v25 = vsel %vm388_vm1, %v4376_v10, 0  ;;  %v493_v29 = vsel %vm388_vm1, %v4374_v9, 0  ;;  %s4255_s13 = smov 16   ;;  %vm1418_vm10 = vcmask 228352   ;;  %vm1536_vm11 = vcmask 220160  }
  0x38   : > { %s4260_s11 = smov 55   ;;  %vm1654_vm12 = vcmask 211968   ;;  %vm1772_vm13 = vcmask 146432   ;;  %vm1890_vm14 = vcmask 138240   ;;  %vm2008_vm15 = vcmask 130048  }
  0x3b   : > { %375 = vrot.lane.b32.xlu1 %v4382_v12, %s4242_s12  ;;  %371 = vrot.lane.b32.xlu0 %v4379_v11, %s4242_s12 }
  0x3f   : > { %377 = vrot.lane.b32.xlu0 %v4390_v14, %s4242_s12  ;;  %582 = vrot.lane.b32.xlu1 %v4376_v10, %s4243_s14 }
  0x43   : > { %584 = vrot.lane.b32.xlu0 %v4379_v11, %s4243_s14  ;;  %586 = vrot.lane.b32.xlu1 %v4374_v9, %s4243_s14 }
  0x47   : > { %588 = vrot.lane.b32.xlu0 %v4382_v12, %s4243_s14  ;;  %590 = vrot.lane.b32.xlu1 %v4390_v14, %s4243_s14 }
  0x4b   : > { %700 = vrot.lane.b32.xlu0 %v4376_v10, %s4244_s23  ;;  %702 = vrot.lane.b32.xlu1 %v4379_v11, %s4244_s23 }
  0x4f   : > { %704 = vrot.lane.b32.xlu0 %v4374_v9, %s4244_s23  ;;  %706 = vrot.lane.b32.xlu1 %v4382_v12, %s4244_s23 }
  0x53   : > { %708 = vrot.lane.b32.xlu0 %v4390_v14, %s4244_s23  ;;  %818 = vrot.lane.b32.xlu1 %v4376_v10, %s4245_s24  ;;  %s4256_s23 = smov 8  }
  0x57   : > { %820 = vrot.lane.b32.xlu0 %v4379_v11, %s4245_s24  ;;  %822 = vrot.lane.b32.xlu1 %v4374_v9, %s4245_s24 }
  0x5b   : > { %824 = vrot.lane.b32.xlu0 %v4382_v12, %s4245_s24  ;;  %826 = vrot.lane.b32.xlu1 %v4390_v14, %s4245_s24 }
  0x5f   : > { %936 = vrot.lane.b32.xlu0 %v4376_v10, %s4246_s26  ;;  %938 = vrot.lane.b32.xlu1 %v4379_v11, %s4246_s26 }
  0x63   : > { %940 = vrot.lane.b32.xlu0 %v4374_v9, %s4246_s26  ;;  %942 = vrot.lane.b32.xlu1 %v4382_v12, %s4246_s26 }
  0x67   : > { %944 = vrot.lane.b32.xlu0 %v4390_v14, %s4246_s26  ;;  %1054 = vrot.lane.b32.xlu1 %v4376_v10, %s4247_s27 }
  0x6b   : > { %1056 = vrot.lane.b32.xlu0 %v4379_v11, %s4247_s27  ;;  %1058 = vrot.lane.b32.xlu1 %v4374_v9, %s4247_s27 }
  0x6f   : > { %1060 = vrot.lane.b32.xlu0 %v4382_v12, %s4247_s27  ;;  %1062 = vrot.lane.b32.xlu1 %v4390_v14, %s4247_s27  ;;  %s4257_s27 = smov 7  }
  0x73   : > { %1172 = vrot.lane.b32.xlu0 %v4376_v10, %s4248_s25  ;;  %1174 = vrot.lane.b32.xlu1 %v4379_v11, %s4248_s25 }
  0x77   : > { %1176 = vrot.lane.b32.xlu0 %v4374_v9, %s4248_s25  ;;  %1178 = vrot.lane.b32.xlu1 %v4382_v12, %s4248_s25 }
  0x7b   : > { %1180 = vrot.lane.b32.xlu0 %v4390_v14, %s4248_s25  ;;  %1290 = vrot.lane.b32.xlu1 %v4376_v10, %s4249_s29 }
  0x7f   : > { %1292 = vrot.lane.b32.xlu0 %v4379_v11, %s4249_s29  ;;  %1294 = vrot.lane.b32.xlu1 %v4374_v9, %s4249_s29 }
  0x83   : > { %1296 = vrot.lane.b32.xlu0 %v4382_v12, %s4249_s29  ;;  %1298 = vrot.lane.b32.xlu1 %v4390_v14, %s4249_s29 }
  0x87   : > { %1408 = vrot.lane.b32.xlu0 %v4376_v10, %s4250_s30  ;;  %1410 = vrot.lane.b32.xlu1 %v4379_v11, %s4250_s30 }
  0x8b   : > { %1412 = vrot.lane.b32.xlu0 %v4374_v9, %s4250_s30  ;;  %1414 = vrot.lane.b32.xlu1 %v4382_v12, %s4250_s30 }
  0x8f   : > { %1416 = vrot.lane.b32.xlu0 %v4390_v14, %s4250_s30  ;;  %1526 = vrot.lane.b32.xlu1 %v4376_v10, %s4251_s5  ;;  %s4258_s30 = smov 6  }
  0x93   : > { %1528 = vrot.lane.b32.xlu0 %v4379_v11, %s4251_s5  ;;  %1530 = vrot.lane.b32.xlu1 %v4374_v9, %s4251_s5 }
  0x97   : > { %1532 = vrot.lane.b32.xlu0 %v4382_v12, %s4251_s5  ;;  %1534 = vrot.lane.b32.xlu1 %v4390_v14, %s4251_s5 }
  0x9b   : > { %1644 = vrot.lane.b32.xlu0 %v4376_v10, %s4252_s6  ;;  %1646 = vrot.lane.b32.xlu1 %v4379_v11, %s4252_s6 }
  0x9f   : > { %1648 = vrot.lane.b32.xlu0 %v4374_v9, %s4252_s6  ;;  %1650 = vrot.lane.b32.xlu1 %v4382_v12, %s4252_s6 }
  0xa3   : > { %1652 = vrot.lane.b32.xlu0 %v4390_v14, %s4252_s6  ;;  %1762 = vrot.lane.b32.xlu1 %v4376_v10, %s4253_s8 }
  0xa7   : > { %1764 = vrot.lane.b32.xlu0 %v4379_v11, %s4253_s8  ;;  %1766 = vrot.lane.b32.xlu1 %v4374_v9, %s4253_s8 }
  0xa9   : > { %v374_v15 = vpop.permute.xlu1 %373  ;;  %v370_v16 = vpop.permute.xlu0 %369 }
  0xab   : > { %1768 = vrot.lane.b32.xlu0 %v4382_v12, %s4253_s8  ;;  %1770 = vrot.lane.b32.xlu1 %v4390_v14, %s4253_s8  ;;  %s4259_s8 = smov 56  }
  0xad   : > { %v376_v17 = vpop.permute.xlu1 %375  ;;  %v372_v18 = vpop.permute.xlu0 %371 }
  0xae   : > { %v381_v19 = vsel %vm379_vm0, %v372_v18, %v374_v15  ;;  %v380_v20 = vsel %vm379_vm0, %v370_v16, %v372_v18  ;;  %v382_v23 = vsel %vm379_vm0, %v374_v15, %v376_v17 }
  0xaf   : > { %3773 = vmatprep.subr.msk.bf16.mxu0 %vm388_vm1, %v381_v19  ;;  %v390_v21 = vsel %vm388_vm1, %v380_v20, 0  ;;  %1880 = vrot.lane.b32.xlu0 %v4376_v10, %s4254_s9  ;;  %v396_v28 = vsel %vm388_vm1, %v382_v23, 0 }
  0xb0   : > { %402 = vmatpush1.bf16.msra.mxu0 %v390_v21  ;;  %1882 = vrot.lane.b32.xlu1 %v4379_v11, %s4254_s9 }
  0xb1   : > { %v378_v24 = vpop.permute.xlu0 %377  ;;  %3777 = vmatprep.subr.msk.bf16.mxu0 %vm388_vm1, %v4379_v11  ;;  %v583_v26 = vpop.permute.xlu1 %582 }
  0xb2   : > { %v383_v27 = vsel %vm379_vm0, %v376_v17, %v378_v24  ;;  %vm2244_vm0 = vcmask 56320  }
  0xb3   : > { %3774 = vmatmul.mubr.msk.bf16.vlgmr.msra.gmra.mrb[0].mxu0 %vm384_vm2, %v3767_v22  ;;  %3775 = vmatprep.subr.msk.bf16.mxu1 %vm388_vm1, %v383_v27 }
  0xb4   : > { %443 = vmatpush1.bf16.msra.mxu1 %v396_v28  ;;  %499 = vmatpush1.bf16.msra.mxu0 %v487_v25  ;;  %v4567_v28 = vcombine.high %v4384_v13, %v4384_v13  ;;  %v3796_v13 = vld [vmem:[%s4978_s2 + $0x14] sm:$0xf] }
  0xb5   : > { %3779 = vmatprep.subr.msk.bf16.mxu1 %vm388_vm1, %v4382_v12  ;;  %v585_v30 = vpop.permute.xlu0 %584  ;;  %v587_v31 = vpop.permute.xlu1 %586  ;;  %530 = vmatprep.mubr.bf16.mxu0 %v4241_v6 }
  0xb6   : > { %v594_v32 = vsel %vm592_vm3, %v585_v30, %v587_v31  ;;  %1884 = vrot.lane.b32.xlu0 %v4374_v9, %s4254_s9  ;;  %1886 = vrot.lane.b32.xlu1 %v4382_v12, %s4254_s9  ;;  %v593_v35 = vsel %vm592_vm3, %v583_v26, %v585_v30 }
  0xb7   : > { %3776 = vmatmul.mubr.msk.bf16.vlgmr.msra.gmra.mrb[0].mxu1 %vm384_vm2, %v3767_v22  ;;  %3782 = vmatprep.subr.msk.bf16.mxu0 %vm388_vm1, %v594_v32  ;;  %v601_v38 = vsel %vm388_vm1, %v593_v35, 0 }
  0xb8   : > { %540 = vmatpush1.bf16.msra.mxu1 %v493_v29  ;;  %571 = vmatprep.mubr.bf16.mxu1 %v4241_v6 }
  0xb9   : > { %v589_v33 = vpop.permute.xlu0 %588  ;;  %v591_v34 = vpop.permute.xlu1 %590 }
  0xba   : > { %v596_v36 = vsel %vm592_vm3, %v589_v33, %v591_v34  ;;  %1888 = vrot.lane.b32.xlu0 %v4390_v14, %s4254_s9  ;;  %1998 = vrot.lane.b32.xlu1 %v4376_v10, %s4255_s13  ;;  %v595_v41 = vsel %vm592_vm3, %v587_v31, %v589_v33  ;;  %vm2362_vm3 = vcmask 48128  }
  0xbb   : > { %3784 = vmatprep.subr.msk.bf16.mxu1 %vm388_vm1, %v596_v36  ;;  %v607_v42 = vsel %vm388_vm1, %v595_v41, 0 }
  0xbd   : > { %v701_v39 = vpop.permute.xlu0 %700  ;;  %v703_v40 = vpop.permute.xlu1 %702 }
  0xbe   : > { %2000 = vrot.lane.b32.xlu0 %v4379_v11, %s4255_s13  ;;  %2002 = vrot.lane.b32.xlu1 %v4374_v9, %s4255_s13  ;;  %v711_v48 = vsel %vm710_vm4, %v701_v39, %v703_v40 }
  0xbf   : > { %3778 = vmatmul.mubr.msk.bf16.vlgmr.msra.gmra.mrb[0].mxu0 %vm384_vm2, %v353_v37  ;;  %v719_v51 = vsel %vm388_vm1, %v711_v48, 0 }
  0xc0   : > { %613 = vmatpush1.bf16.msra.mxu0 %v601_v38  ;;  %644 = vmatprep.mubr.bf16.mxu0 %v4241_v6 }
  0xc1   : > { %v705_v43 = vpop.permute.xlu0 %704  ;;  %v707_v44 = vpop.permute.xlu1 %706 }
  0xc2   : > { %v712_v45 = vsel %vm710_vm4, %v703_v40, %v705_v43  ;;  %2004 = vrot.lane.b32.xlu0 %v4382_v12, %s4255_s13  ;;  %2006 = vrot.lane.b32.xlu1 %v4390_v14, %s4255_s13  ;;  %v713_v54 = vsel %vm710_vm4, %v705_v43, %v707_v44  ;;  %s4261_s13 = smov 54  }
  0xc3   : > { %3780 = vmatmul.mubr.msk.bf16.vlgmr.msra.gmra.mrb[0].mxu1 %vm384_vm2, %v353_v37  ;;  %3787 = vmatprep.subr.msk.bf16.mxu0 %vm388_vm1, %v712_v45  ;;  %v725_v56 = vsel %vm388_vm1, %v713_v54, 0 }
  0xc4   : > { %654 = vmatpush1.bf16.msra.mxu1 %v607_v42  ;;  %685 = vmatprep.mubr.bf16.mxu1 %v4241_v6 }
  0xc5   : > { %v709_v46 = vpop.permute.xlu0 %708  ;;  %v819_v47 = vpop.permute.xlu1 %818 }
  0xc6   : > { %v714_v49 = vsel %vm710_vm4, %v707_v44, %v709_v46  ;;  %2116 = vrot.lane.b32.xlu0 %v4376_v10, %s4256_s23  ;;  %2118 = vrot.lane.b32.xlu1 %v4379_v11, %s4256_s23  ;;  %v3801_v44 = vld [vmem:[%s4978_s2 + $0x18] sm:$0xf]  ;;  %vm2482_vm4 = vcmask 457728  }
  0xc7   : > { %3789 = vmatprep.subr.msk.bf16.mxu1 %vm388_vm1, %v714_v49 }
  0xc9   : > { %v821_v52 = vpop.permute.xlu0 %820  ;;  %v823_v53 = vpop.permute.xlu1 %822 }
  0xca   : > { %v830_v55 = vsel %vm828_vm5, %v821_v52, %v823_v53  ;;  %2120 = vrot.lane.b32.xlu0 %v4374_v9, %s4256_s23  ;;  %2122 = vrot.lane.b32.xlu1 %v4382_v12, %s4256_s23  ;;  %v829_v62 = vsel %vm828_vm5, %v819_v47, %v821_v52 }
  0xcb   : > { %3783 = vmatmul.mubr.msk.bf16.vlgmr.msra.gmra.mrb[0].mxu0 %vm384_vm2, %v3781_v50  ;;  %v837_v0 = vsel %vm388_vm1, %v829_v62, 0 }
  0xcc   : > { %731 = vmatpush1.bf16.msra.mxu0 %v719_v51  ;;  %762 = vmatprep.mubr.bf16.mxu0 %v4241_v6 }
  0xcd   : > { %v825_v57 = vpop.permute.xlu0 %824  ;;  %3792 = vmatprep.subr.msk.bf16.mxu0 %vm388_vm1, %v830_v55  ;;  %v827_v58 = vpop.permute.xlu1 %826 }
  0xce   : > { %v832_v59 = vsel %vm828_vm5, %v825_v57, %v827_v58  ;;  %2124 = vrot.lane.b32.xlu0 %v4390_v14, %s4256_s23  ;;  %2234 = vrot.lane.b32.xlu1 %v4376_v10, %s4257_s27  ;;  %v831_v3 = vsel %vm828_vm5, %v823_v53, %v825_v57  ;;  %s4262_s23 = smov 46   ;;  %v3806_v57 = vld [vmem:[%s4978_s2 + $0x1c] sm:$0xf]  ;;  %vm2600_vm5 = vcmask 449536  }
  0xcf   : > { %3785 = vmatmul.mubr.msk.bf16.vlgmr.msra.gmra.mrb[0].mxu1 %vm384_vm2, %v3781_v50  ;;  %v843_v5 = vsel %vm388_vm1, %v831_v3, 0 }
  0xd0   : > { %772 = vmatpush1.bf16.msra.mxu1 %v725_v56  ;;  %803 = vmatprep.mubr.bf16.mxu1 %v4241_v6 }
  0xd1   : > { %3794 = vmatprep.subr.msk.bf16.mxu1 %vm388_vm1, %v832_v59  ;;  %v937_v60 = vpop.permute.xlu0 %936  ;;  %v939_v61 = vpop.permute.xlu1 %938 }
  0xd2   : > { %2236 = vrot.lane.b32.xlu0 %v4379_v11, %s4257_s27  ;;  %2238 = vrot.lane.b32.xlu1 %v4374_v9, %s4257_s27  ;;  %v947_v18 = vsel %vm946_vm6, %v937_v60, %v939_v61 }
  0xd3   : > { %v955_v19 = vsel %vm388_vm1, %v947_v18, 0 }
  0xd5   : > { %v941_v1 = vpop.permute.xlu0 %940  ;;  %v943_v2 = vpop.permute.xlu1 %942 }
  0xd6   : > { %v948_v4 = vsel %vm946_vm6, %v939_v61, %v941_v1  ;;  %2240 = vrot.lane.b32.xlu0 %v4382_v12, %s4257_s27  ;;  %2242 = vrot.lane.b32.xlu1 %v4390_v14, %s4257_s27  ;;  %v949_v22 = vsel %vm946_vm6, %v941_v1, %v943_v2  ;;  %s4263_s27 = smov 45  }
  0xd7   : > { %3788 = vmatmul.mubr.msk.bf16.vlgmr.msra.gmra.mrb[0].mxu0 %vm384_vm2, %v3786_v63  ;;  %v961_v24 = vsel %vm388_vm1, %v949_v22, 0 }
  0xd8   : > { %849 = vmatpush1.bf16.msra.mxu0 %v837_v0  ;;  %880 = vmatprep.mubr.bf16.mxu0 %v4241_v6 }
  0xd9   : > { %3797 = vmatprep.subr.msk.bf16.mxu0 %vm388_vm1, %v948_v4  ;;  %v945_v7 = vpop.permute.xlu0 %944  ;;  %v1055_v8 = vpop.permute.xlu1 %1054 }
  0xda   : > { %v950_v15 = vsel %vm946_vm6, %v943_v2, %v945_v7  ;;  %2352 = vrot.lane.b32.xlu0 %v4376_v10, %s4258_s30  ;;  %2354 = vrot.lane.b32.xlu1 %v4379_v11, %s4258_s30  ;;  %v3791_v10 = vld [vmem:[%s4978_s2 + $0x10] sm:$0xf]  ;;  %v3811_v7 = vld [vmem:[%s4978_s2 + $0x20] sm:$0xf]  ;;  %vm2718_vm6 = vcmask 441344  }
  0xdb   : > { %3790 = vmatmul.mubr.msk.bf16.vlgmr.msra.gmra.mrb[0].mxu1 %vm384_vm2, %v3786_v63 }
  0xdc   : > { %890 = vmatpush1.bf16.msra.mxu1 %v843_v5  ;;  %921 = vmatprep.mubr.bf16.mxu1 %v4241_v6 }
  0xdd   : > { %3799 = vmatprep.subr.msk.bf16.mxu1 %vm388_vm1, %v950_v15  ;;  %v1057_v16 = vpop.permute.xlu0 %1056  ;;  %v1059_v17 = vpop.permute.xlu1 %1058 }
  0xde   : > { %2356 = vrot.lane.b32.xlu0 %v4374_v9, %s4258_s30  ;;  %2358 = vrot.lane.b32.xlu1 %v4382_v12, %s4258_s30  ;;  %v1066_v23 = vsel %vm1064_vm7, %v1057_v16, %v1059_v17  ;;  %v1065_v31 = vsel %vm1064_vm7, %v1055_v8, %v1057_v16 }
  0xdf   : > { %v1073_v32 = vsel %vm388_vm1, %v1065_v31, 0 }
  0xe1   : > { %v1061_v20 = vpop.permute.xlu0 %1060  ;;  %v1063_v21 = vpop.permute.xlu1 %1062 }
  0xe2   : > { %2360 = vrot.lane.b32.xlu0 %v4390_v14, %s4258_s30  ;;  %2472 = vrot.lane.b32.xlu1 %v4379_v11, %s4259_s8  ;;  %v1068_v27 = vsel %vm1064_vm7, %v1061_v20, %v1063_v21  ;;  %v1067_v35 = vsel %vm1064_vm7, %v1059_v17, %v1061_v20  ;;  %s4264_s30 = smov 44   ;;  %vm2836_vm7 = vcmask 375808  }
  0xe3   : > { %3793 = vmatmul.mubr.msk.bf16.vlgmr.msra.gmra.mrb[0].mxu0 %vm384_vm2, %v3791_v10  ;;  %v1079_v37 = vsel %vm388_vm1, %v1067_v35, 0 }
  0xe4   : > { %967 = vmatpush1.bf16.msra.mxu0 %v955_v19  ;;  %998 = vmatprep.mubr.bf16.mxu0 %v4241_v6 }
  0xe5   : > { %3802 = vmatprep.subr.msk.bf16.mxu0 %vm388_vm1, %v1066_v23  ;;  %v1173_v25 = vpop.permute.xlu0 %1172  ;;  %v1175_v26 = vpop.permute.xlu1 %1174 }
  0xe6   : > { %2474 = vrot.lane.b32.xlu0 %v4374_v9, %s4259_s8  ;;  %2476 = vrot.lane.b32.xlu1 %v4382_v12, %s4259_s8  ;;  %v1183_v43 = vsel %vm1182_vm8, %v1173_v25, %v1175_v26  ;;  %v3816_v25 = vld [vmem:[%s4978_s2 + $0x24] sm:$0xf] }
  0xe7   : > { %3795 = vmatmul.mubr.msk.bf16.vlgmr.msra.gmra.mrb[0].mxu1 %vm384_vm2, %v3791_v10  ;;  %v1191_v45 = vsel %vm388_vm1, %v1183_v43, 0 }
  0xe8   : > { %1008 = vmatpush1.bf16.msra.mxu1 %v961_v24  ;;  %1039 = vmatprep.mubr.bf16.mxu1 %v4241_v6 }
  0xe9   : > { %3804 = vmatprep.subr.msk.bf16.mxu1 %vm388_vm1, %v1068_v27  ;;  %v1177_v29 = vpop.permute.xlu0 %1176  ;;  %v1179_v30 = vpop.permute.xlu1 %1178 }
  0xea   : > { %2478 = vrot.lane.b32.xlu0 %v4390_v14, %s4259_s8  ;;  %2480 = vrot.lane.b32.xlu1 %v4567_v28, %s4259_s8  ;;  %v1184_v36 = vsel %vm1182_vm8, %v1175_v26, %v1177_v29  ;;  %v1185_v48 = vsel %vm1182_vm8, %v1177_v29, %v1179_v30  ;;  %s4265_s8 = smov 36  }
  0xeb   : > { %v1197_v50 = vsel %vm388_vm1, %v1185_v48, 0 }
  0xed   : > { %v1181_v33 = vpop.permute.xlu0 %1180  ;;  %v1291_v34 = vpop.permute.xlu1 %1290 }
  0xee   : > { %2590 = vrot.lane.b32.xlu0 %v4379_v11, %s4260_s11  ;;  %2592 = vrot.lane.b32.xlu1 %v4374_v9, %s4260_s11  ;;  %v1186_v40 = vsel %vm1182_vm8, %v1179_v30, %v1181_v33  ;;  %vm2954_vm8 = vcmask 367616  }
  0xef   : > { %3798 = vmatmul.mubr.msk.bf16.vlgmr.msra.gmra.mrb[0].mxu0 %vm384_vm2, %v3796_v13 }
  0xf0   : > { %1085 = vmatpush1.bf16.msra.mxu0 %v1073_v32  ;;  %1116 = vmatprep.mubr.bf16.mxu0 %v4241_v6 }
  0xf1   : > { %3807 = vmatprep.subr.msk.bf16.mxu0 %vm388_vm1, %v1184_v36  ;;  %v1293_v38 = vpop.permute.xlu0 %1292  ;;  %v1295_v39 = vpop.permute.xlu1 %1294  ;;  %v3821_v36 = vld [vmem:[%s4978_s2 + $0x28] sm:$0xf] }
  0xf2   : > { %2594 = vrot.lane.b32.xlu0 %v4382_v12, %s4260_s11  ;;  %2596 = vrot.lane.b32.xlu1 %v4390_v14, %s4260_s11  ;;  %v1302_v49 = vsel %vm1300_vm9, %v1293_v38, %v1295_v39  ;;  %v1301_v56 = vsel %vm1300_vm9, %v1291_v34, %v1293_v38 }
  0xf3   : > { %3800 = vmatmul.mubr.msk.bf16.vlgmr.msra.gmra.mrb[0].mxu1 %vm384_vm2, %v3796_v13  ;;  %v1309_v58 = vsel %vm388_vm1, %v1301_v56, 0 }
  0xf4   : > { %1126 = vmatpush1.bf16.msra.mxu1 %v1079_v37  ;;  %1157 = vmatprep.mubr.bf16.mxu1 %v4241_v6 }
  0xf5   : > { %3809 = vmatprep.subr.msk.bf16.mxu1 %vm388_vm1, %v1186_v40  ;;  %v1297_v41 = vpop.permute.xlu0 %1296  ;;  %v1299_v42 = vpop.permute.xlu1 %1298 }
  0xf6   : > { %2598 = vrot.lane.b32.xlu0 %v4567_v28, %s4260_s11  ;;  %2708 = vrot.lane.b32.xlu1 %v4379_v11, %s4261_s13  ;;  %v1304_v53 = vsel %vm1300_vm9, %v1297_v41, %v1299_v42  ;;  %v1303_v61 = vsel %vm1300_vm9, %v1295_v39, %v1297_v41  ;;  %s4266_s11 = smov 35   ;;  %vm3072_vm9 = vcmask 359424  }
  0xf7   : > { %v1315_v63 = vsel %vm388_vm1, %v1303_v61, 0 }
  0xf9   : > { %v1409_v46 = vpop.permute.xlu0 %1408  ;;  %v1411_v47 = vpop.permute.xlu1 %1410 }
  0xfa   : > { %2710 = vrot.lane.b32.xlu0 %v4374_v9, %s4261_s13  ;;  %2712 = vrot.lane.b32.xlu1 %v4382_v12, %s4261_s13  ;;  %v1419_v5 = vsel %vm1418_vm10, %v1409_v46, %v1411_v47 }
  0xfb   : > { %3803 = vmatmul.mubr.msk.bf16.vlgmr.msra.gmra.mrb[0].mxu0 %vm384_vm2, %v3801_v44  ;;  %v1427_v8 = vsel %vm388_vm1, %v1419_v5, 0 }
  0xfc   : > { %1203 = vmatpush1.bf16.msra.mxu0 %v1191_v45  ;;  %1234 = vmatprep.mubr.bf16.mxu0 %v4241_v6 }
  0xfd   : > { %3812 = vmatprep.subr.msk.bf16.mxu0 %vm388_vm1, %v1302_v49  ;;  %v1413_v51 = vpop.permute.xlu0 %1412  ;;  %v1415_v52 = vpop.permute.xlu1 %1414  ;;  %v3826_v49 = vld [vmem:[%s4978_s2 + $0x2c] sm:$0xf] }
  0xfe   : > { %2714 = vrot.lane.b32.xlu0 %v4390_v14, %s4261_s13  ;;  %2716 = vrot.lane.b32.xlu1 %v4567_v28, %s4261_s13  ;;  %v1420_v62 = vsel %vm1418_vm10, %v1411_v47, %v1413_v51  ;;  %v1421_v17 = vsel %vm1418_vm10, %v1413_v51, %v1415_v52  ;;  %s4267_s13 = smov 34  }
  0xff   : > { %3805 = vmatmul.mubr.msk.bf16.vlgmr.msra.gmra.mrb[0].mxu1 %vm384_vm2, %v3801_v44  ;;  %v1433_v10 = vsel %vm388_vm1, %v1421_v17, 0 }
 0x100   : > { %1244 = vmatpush1.bf16.msra.mxu1 %v1197_v50  ;;  %1275 = vmatprep.mubr.bf16.mxu1 %v4241_v6 }
 0x101   : > { %3814 = vmatprep.subr.msk.bf16.mxu1 %vm388_vm1, %v1304_v53  ;;  %v1417_v54 = vpop.permute.xlu0 %1416  ;;  %v1527_v55 = vpop.permute.xlu1 %1526 }
 0x102   : > { %2826 = vrot.lane.b32.xlu0 %v4379_v11, %s4262_s23  ;;  %2828 = vrot.lane.b32.xlu1 %v4374_v9, %s4262_s23  ;;  %v1422_v2 = vsel %vm1418_vm10, %v1415_v52, %v1417_v54  ;;  %vm3190_vm10 = vcmask 293888  }
 0x105   : > { %v1529_v59 = vpop.permute.xlu0 %1528  ;;  %v1531_v60 = vpop.permute.xlu1 %1530 }
 0x106   : > { %2830 = vrot.lane.b32.xlu0 %v4382_v12, %s4262_s23  ;;  %2832 = vrot.lane.b32.xlu1 %v4390_v14, %s4262_s23  ;;  %v1538_v18 = vsel %vm1536_vm11, %v1529_v59, %v1531_v60  ;;  %v1537_v24 = vsel %vm1536_vm11, %v1527_v55, %v1529_v59 }
 0x107   : > { %3808 = vmatmul.mubr.msk.bf16.vlgmr.msra.gmra.mrb[0].mxu0 %vm384_vm2, %v3806_v57  ;;  %v1545_v26 = vsel %vm388_vm1, %v1537_v24, 0 }
 0x108   : > { %1321 = vmatpush1.bf16.msra.mxu0 %v1309_v58  ;;  %1352 = vmatprep.mubr.bf16.mxu0 %v4241_v6 }
 0x109   : > { %3817 = vmatprep.subr.msk.bf16.mxu0 %vm388_vm1, %v1420_v62  ;;  %v1533_v0 = vpop.permute.xlu0 %1532  ;;  %v1535_v1 = vpop.permute.xlu1 %1534 }
 0x10a   : > { %2834 = vrot.lane.b32.xlu0 %v4567_v28, %s4262_s23  ;;  %2944 = vrot.lane.b32.xlu1 %v4379_v11, %s4263_s27  ;;  %v1540_v21 = vsel %vm1536_vm11, %v1533_v0, %v1535_v1  ;;  %v1539_v29 = vsel %vm1536_vm11, %v1531_v60, %v1533_v0  ;;  %vm3308_vm11 = vcmask 285696  }
 0x10b   : > { %3810 = vmatmul.mubr.msk.bf16.vlgmr.msra.gmra.mrb[0].mxu1 %vm384_vm2, %v3806_v57  ;;  %v1551_v13 = vsel %vm388_vm1, %v1539_v29, 0 }
 0x10c   : > { %1362 = vmatpush1.bf16.msra.mxu1 %v1315_v63  ;;  %1393 = vmatprep.mubr.bf16.mxu1 %v4241_v6 }
 0x10d   : > { %3819 = vmatprep.subr.msk.bf16.mxu1 %vm388_vm1, %v1422_v2  ;;  %v1645_v3 = vpop.permute.xlu0 %1644  ;;  %v1647_v4 = vpop.permute.xlu1 %1646 }
 0x10e   : > { %2946 = vrot.lane.b32.xlu0 %v4374_v9, %s4263_s27  ;;  %2948 = vrot.lane.b32.xlu1 %v4382_v12, %s4263_s27  ;;  %v1655_v35 = vsel %vm1654_vm12, %v1645_v3, %v1647_v4 }
 0x10f   : > { %v1663_v39 = vsel %vm388_vm1, %v1655_v35, 0 }
 0x111   : > { %v1649_v15 = vpop.permute.xlu0 %1648  ;;  %v1651_v16 = vpop.permute.xlu1 %1650 }
 0x112   : > { %2950 = vrot.lane.b32.xlu0 %v4390_v14, %s4263_s27  ;;  %2952 = vrot.lane.b32.xlu1 %v4567_v28, %s4263_s27  ;;  %v1656_v30 = vsel %vm1654_vm12, %v1647_v4, %v1649_v15  ;;  %v1657_v40 = vsel %vm1654_vm12, %v1649_v15, %v1651_v16 }
 0x113   : > { %3813 = vmatmul.mubr.msk.bf16.vlgmr.msra.gmra.mrb[0].mxu0 %vm384_vm2, %v3811_v7  ;;  %v1669_v44 = vsel %vm388_vm1, %v1657_v40, 0 }
 0x114   : > { %1439 = vmatpush1.bf16.msra.mxu0 %v1427_v8  ;;  %1470 = vmatprep.mubr.bf16.mxu0 %v4241_v6 }
 0x115   : > { %3822 = vmatprep.subr.msk.bf16.mxu0 %vm388_vm1, %v1538_v18  ;;  %v1653_v19 = vpop.permute.xlu0 %1652  ;;  %v4650_v20 = vpop.permute.xlu1 %1762 }
 0x116   : > { %3062 = vrot.lane.b32.xlu0 %v4379_v11, %s4264_s30  ;;  %3064 = vrot.lane.b32.xlu1 %v4374_v9, %s4264_s30  ;;  %v1658_v32 = vsel %vm1654_vm12, %v1651_v16, %v1653_v19  ;;  %vm3426_vm12 = vcmask 277504  }
 0x117   : > { %3815 = vmatmul.mubr.msk.bf16.vlgmr.msra.gmra.mrb[0].mxu1 %vm384_vm2, %v3811_v7  ;;  %v3836_v7 = vld [vmem:[%s4978_s2 + $0x34] sm:$0xf] }
 0x118   : > { %1480 = vmatpush1.bf16.msra.mxu1 %v1433_v10  ;;  %1511 = vmatprep.mubr.bf16.mxu1 %v4241_v6 }
 0x119   : > { %3824 = vmatprep.subr.msk.bf16.mxu1 %vm388_vm1, %v1540_v21  ;;  %v1765_v22 = vpop.permute.xlu0 %1764  ;;  %v4658_v23 = vpop.permute.xlu1 %1766 }
 0x11a   : > { %3066 = vrot.lane.b32.xlu0 %v4382_v12, %s4264_s30  ;;  %3068 = vrot.lane.b32.xlu1 %v4390_v14, %s4264_s30  ;;  %v1774_v41 = vsel %vm1772_vm13, %v1765_v22, %v4658_v23  ;;  %v1773_v48 = vsel %vm1772_vm13, %v4650_v20, %v1765_v22 }
 0x11b   : > { %v1781_v52 = vsel %vm388_vm1, %v1773_v48, 0 }
 0x11d   : > { %v1769_v27 = vpop.permute.xlu0 %1768  ;;  %v1771_v31 = vpop.permute.xlu1 %1770 }
 0x11e   : > { %3070 = vrot.lane.b32.xlu0 %v4567_v28, %s4264_s30  ;;  %3180 = vrot.lane.b32.xlu1 %v4379_v11, %s4265_s8  ;;  %v1776_v45 = vsel %vm1772_vm13, %v1769_v27, %v1771_v31  ;;  %v1775_v53 = vsel %vm1772_vm13, %v4658_v23, %v1769_v27 }
 0x11f   : > { %3818 = vmatmul.mubr.msk.bf16.vlgmr.msra.gmra.mrb[0].mxu0 %vm384_vm2, %v3816_v25  ;;  %v1787_v56 = vsel %vm388_vm1, %v1775_v53, 0 }
 0x120   : > { %1557 = vmatpush1.bf16.msra.mxu0 %v1545_v26  ;;  %1588 = vmatprep.mubr.bf16.mxu0 %v4241_v6 }
 0x121   : > { %3827 = vmatprep.subr.msk.bf16.mxu0 %vm388_vm1, %v1656_v30  ;;  %v4676_v33 = vpop.permute.xlu0 %1880 }
 0x122   : > { %v4678_v34 = vpop.permute.xlu1 %1882  ;;  %3182 = vrot.lane.b32.xlu0 %v4374_v9, %s4265_s8  ;;  %3184 = vrot.lane.b32.xlu1 %v4382_v12, %s4265_s8 }
 0x123   : > { %3820 = vmatmul.mubr.msk.bf16.vlgmr.msra.gmra.mrb[0].mxu1 %vm384_vm2, %v3816_v25  ;;  %v1891_v58 = vsel %vm1890_vm14, %v4676_v33, %v4678_v34  ;;  %v3841_v25 = vld [vmem:[%s4978_s2 + $0x38] sm:$0xf] }
 0x124   : > { %1598 = vmatpush1.bf16.msra.mxu1 %v1551_v13  ;;  %1629 = vmatprep.mubr.bf16.mxu1 %v4241_v6  ;;  %v1899_v60 = vsel %vm388_vm1, %v1891_v58, 0 }
 0x125   : > { %3829 = vmatprep.subr.msk.bf16.mxu1 %vm388_vm1, %v1658_v32 }
 0x126   : > { %3186 = vrot.lane.b32.xlu0 %v4390_v14, %s4265_s8  ;;  %3188 = vrot.lane.b32.xlu1 %v4567_v28, %s4265_s8 }
 0x128   : > { %v1885_v37 = vpop.permute.xlu0 %1884  ;;  %v1887_v38 = vpop.permute.xlu1 %1886 }
 0x129   : > { %v1892_v54 = vsel %vm1890_vm14, %v4678_v34, %v1885_v37  ;;  %v1893_v61 = vsel %vm1890_vm14, %v1885_v37, %v1887_v38 }
 0x12a   : > { %3298 = vrot.lane.b32.xlu0 %v4379_v11, %s4266_s11  ;;  %3300 = vrot.lane.b32.xlu1 %v4374_v9, %s4266_s11  ;;  %v1905_v1 = vsel %vm388_vm1, %v1893_v61, 0 }
 0x12b   : > { %3823 = vmatmul.mubr.msk.bf16.vlgmr.msra.gmra.mrb[0].mxu0 %vm384_vm2, %v3821_v36 }
 0x12c   : > { %1675 = vmatpush1.bf16.msra.mxu0 %v1663_v39  ;;  %1706 = vmatprep.mubr.bf16.mxu0 %v4241_v6  ;;  %v1889_v42 = vpop.permute.xlu0 %1888  ;;  %v4699_v43 = vpop.permute.xlu1 %1998 }
 0x12d   : > { %3832 = vmatprep.subr.msk.bf16.mxu0 %vm388_vm1, %v1774_v41  ;;  %v1894_v57 = vsel %vm1890_vm14, %v1887_v38, %v1889_v42 }
 0x12e   : > { %3302 = vrot.lane.b32.xlu0 %v4382_v12, %s4266_s11  ;;  %3304 = vrot.lane.b32.xlu1 %v4390_v14, %s4266_s11 }
 0x12f   : > { %3825 = vmatmul.mubr.msk.bf16.vlgmr.msra.gmra.mrb[0].mxu1 %vm384_vm2, %v3821_v36  ;;  %v3846_v36 = vld [vmem:[%s4978_s2 + $0x3c] sm:$0xf] }
 0x130   : > { %1716 = vmatpush1.bf16.msra.mxu1 %v1669_v44  ;;  %1747 = vmatprep.mubr.bf16.mxu1 %v4241_v6  ;;  %v2001_v46 = vpop.permute.xlu0 %2000  ;;  %v2003_v47 = vpop.permute.xlu1 %2002 }
 0x131   : > { %3834 = vmatprep.subr.msk.bf16.mxu1 %vm388_vm1, %v1776_v45  ;;  %v2010_v62 = vsel %vm2008_vm15, %v2001_v46, %v2003_v47  ;;  %v2009_v5 = vsel %vm2008_vm15, %v4699_v43, %v2001_v46 }
 0x132   : > { %3306 = vrot.lane.b32.xlu0 %v4567_v28, %s4266_s11  ;;  %3416 = vrot.lane.b32.xlu1 %v4379_v11, %s4267_s13  ;;  %v2017_v16 = vsel %vm388_vm1, %v2009_v5, 0 }
 0x134   : > { %v2005_v50 = vpop.permute.xlu0 %2004  ;;  %v2007_v51 = vpop.permute.xlu1 %2006 }
 0x135   : > { %v2012_v2 = vsel %vm2008_vm15, %v2005_v50, %v2007_v51  ;;  %v2011_v17 = vsel %vm2008_vm15, %v2003_v47, %v2005_v50  ;;  %v3851_v47 = vld [vmem:[%s4978_s2 + $0x40] sm:$0xf] }
 0x136   : > { %3418 = vrot.lane.b32.xlu0 %v4374_v9, %s4267_s13  ;;  %3420 = vrot.lane.b32.xlu1 %v4382_v12, %s4267_s13  ;;  %v2023_v10 = vsel %vm388_vm1, %v2011_v17, 0 }
 0x137   : > { %3828 = vmatmul.mubr.msk.bf16.vlgmr.msra.gmra.mrb[0].mxu0 %vm384_vm2, %v3826_v49 }
 0x138   : > { %1793 = vmatpush1.bf16.msra.mxu0 %v1781_v52  ;;  %1824 = vmatprep.mubr.bf16.mxu0 %v4241_v6  ;;  %v2117_v11 = vpop.permute.xlu0 %2116  ;;  %v2119_v55 = vpop.permute.xlu1 %2118 }
 0x139   : > { %3837 = vmatprep.subr.msk.bf16.mxu0 %vm388_vm1, %v1892_v54  ;;  %v2127_v22 = vsel %vm384_vm2, %v2117_v11, %v2119_v55 }
 0x13a   : > { %3422 = vrot.lane.b32.xlu0 %v4390_v14, %s4267_s13  ;;  %3424 = vrot.lane.b32.xlu1 %v4567_v28, %s4267_s13  ;;  %v3831_v14 = vld [vmem:[%s4978_s2 + $0x30] sm:$0xf]  ;;  %v2135_v26 = vsel %vm388_vm1, %v2127_v22, 0 }
 0x13b   : > { %3830 = vmatmul.mubr.msk.bf16.vlgmr.msra.gmra.mrb[0].mxu1 %vm384_vm2, %v3826_v49 }
 0x13c   : > { %1834 = vmatpush1.bf16.msra.mxu1 %v1787_v56  ;;  %1865 = vmatprep.mubr.bf16.mxu1 %v4241_v6  ;;  %v2121_v9 = vpop.permute.xlu0 %2120  ;;  %v2123_v12 = vpop.permute.xlu1 %2122 }
 0x13d   : > { %3839 = vmatprep.subr.msk.bf16.mxu1 %vm388_vm1, %v1894_v57  ;;  %v2128_v18 = vsel %vm384_vm2, %v2119_v55, %v2121_v9  ;;  %v2129_v27 = vsel %vm384_vm2, %v2121_v9, %v2123_v12  ;;  %v3856_v57 = vld [vmem:[%s4978_s2 + $0x44] sm:$0xf] }
 0x13e   : > { %v2141_v31 = vsel %vm388_vm1, %v2129_v27, 0 }
 0x140   : > { %v2125_v59 = vpop.permute.xlu0 %2124  ;;  %v2235_v28 = vpop.permute.xlu1 %2234 }
 0x141   : > { %v2130_v21 = vsel %vm384_vm2, %v2123_v12, %v2125_v59 }
 0x143   : > { %3833 = vmatmul.mubr.msk.bf16.vlgmr.msra.gmra.mrb[0].mxu0 %vm384_vm2, %v3831_v14 }
 0x144   : > { %1911 = vmatpush1.bf16.msra.mxu0 %v1899_v60  ;;  %1942 = vmatprep.mubr.bf16.mxu0 %v4241_v6  ;;  %v2237_v63 = vpop.permute.xlu0 %2236  ;;  %v2239_v0 = vpop.permute.xlu1 %2238 }
 0x145   : > { %3842 = vmatprep.subr.msk.bf16.mxu0 %vm388_vm1, %v2010_v62  ;;  %v2246_v29 = vsel %vm2244_vm0, %v2237_v63, %v2239_v0  ;;  %v2245_v34 = vsel %vm2244_vm0, %v2235_v28, %v2237_v63 }
 0x146   : > { %v2253_v37 = vsel %vm388_vm1, %v2245_v34, 0 }
 0x147   : > { %3835 = vmatmul.mubr.msk.bf16.vlgmr.msra.gmra.mrb[0].mxu1 %vm384_vm2, %v3831_v14 }
 0x148   : > { %1952 = vmatpush1.bf16.msra.mxu1 %v1905_v1  ;;  %1983 = vmatprep.mubr.bf16.mxu1 %v4241_v6  ;;  %v2241_v3 = vpop.permute.xlu0 %2240  ;;  %v2243_v4 = vpop.permute.xlu1 %2242 }
 0x149   : > { %3844 = vmatprep.subr.msk.bf16.mxu1 %vm388_vm1, %v2012_v2  ;;  %v2248_v32 = vsel %vm2244_vm0, %v2241_v3, %v2243_v4  ;;  %v2247_v38 = vsel %vm2244_vm0, %v2239_v0, %v2241_v3  ;;  %v3861_v0 = vld [vmem:[%s4978_s2 + $0x48] sm:$0xf] }
 0x14a   : > { %v2259_v42 = vsel %vm388_vm1, %v2247_v38, 0 }
 0x14c   : > { %v2353_v8 = vpop.permute.xlu0 %2352  ;;  %v2355_v15 = vpop.permute.xlu1 %2354 }
 0x14d   : > { %v2363_v46 = vsel %vm2362_vm3, %v2353_v8, %v2355_v15 }
 0x14e   : > { %v2371_v48 = vsel %vm388_vm1, %v2363_v46, 0 }
 0x14f   : > { %3838 = vmatmul.mubr.msk.bf16.vlgmr.msra.gmra.mrb[0].mxu0 %vm384_vm2, %v3836_v7 }
 0x150   : > { %2029 = vmatpush1.bf16.msra.mxu0 %v2017_v16  ;;  %2060 = vmatprep.mubr.bf16.mxu0 %v4241_v6  ;;  %v2357_v19 = vpop.permute.xlu0 %2356  ;;  %v2359_v20 = vpop.permute.xlu1 %2358 }
 0x151   : > { %3847 = vmatprep.subr.msk.bf16.mxu0 %vm388_vm1, %v2128_v18  ;;  %v2364_v39 = vsel %vm2362_vm3, %v2355_v15, %v2357_v19  ;;  %v2365_v49 = vsel %vm2362_vm3, %v2357_v19, %v2359_v20 }
 0x152   : > { %v2377_v53 = vsel %vm388_vm1, %v2365_v49, 0 }
 0x153   : > { %3840 = vmatmul.mubr.msk.bf16.vlgmr.msra.gmra.mrb[0].mxu1 %vm384_vm2, %v3836_v7 }
 0x154   : > { %2070 = vmatpush1.bf16.msra.mxu1 %v2023_v10  ;;  %2101 = vmatprep.mubr.bf16.mxu1 %v4241_v6  ;;  %v2361_v23 = vpop.permute.xlu0 %2360  ;;  %v2473_v24 = vpop.permute.xlu1 %2472  ;;  %v3867_v10 = vld [vmem:[%s4978_s2 + $0x4c] sm:$0xf] }
 0x155   : > { %3849 = vmatprep.subr.msk.bf16.mxu1 %vm388_vm1, %v2130_v21  ;;  %v2366_v43 = vsel %vm2362_vm3, %v2359_v20, %v2361_v23 }
 0x158   : > { %v2475_v30 = vpop.permute.xlu0 %2474  ;;  %v2477_v13 = vpop.permute.xlu1 %2476 }
 0x159   : > { %v2484_v50 = vsel %vm2482_vm4, %v2475_v30, %v2477_v13  ;;  %v2483_v56 = vsel %vm2482_vm4, %v2473_v24, %v2475_v30 }
 0x15a   : > { %v2491_v9 = vsel %vm388_vm1, %v2483_v56, 0 }
 0x15b   : > { %3843 = vmatmul.mubr.msk.bf16.vlgmr.msra.gmra.mrb[0].mxu0 %vm384_vm2, %v3841_v25 }
 0x15c   : > { %2147 = vmatpush1.bf16.msra.mxu0 %v2135_v26  ;;  %2178 = vmatprep.mubr.bf16.mxu0 %v4241_v6  ;;  %v2479_v33 = vpop.permute.xlu0 %2478  ;;  %v2481_v35 = vpop.permute.xlu1 %2480 }
 0x15d   : > { %3852 = vmatprep.subr.msk.bf16.mxu0 %vm388_vm1, %v2246_v29  ;;  %v2486_v54 = vsel %vm2482_vm4, %v2479_v33, %v2481_v35  ;;  %v2485_v58 = vsel %vm2482_vm4, %v2477_v13, %v2479_v33 }
 0x15e   : > { %v2497_v28 = vsel %vm388_vm1, %v2485_v58, 0 }
 0x15f   : > { %3845 = vmatmul.mubr.msk.bf16.vlgmr.msra.gmra.mrb[0].mxu1 %vm384_vm2, %v3841_v25 }
 0x160   : > { %2188 = vmatpush1.bf16.msra.mxu1 %v2141_v31  ;;  %2219 = vmatprep.mubr.bf16.mxu1 %v4241_v6  ;;  %v2591_v40 = vpop.permute.xlu0 %2590  ;;  %v2593_v41 = vpop.permute.xlu1 %2592  ;;  %v3872_v31 = vld [vmem:[%s4978_s2 + $0x50] sm:$0xf] }
 0x161   : > { %3854 = vmatprep.subr.msk.bf16.mxu1 %vm388_vm1, %v2248_v32  ;;  %v2601_v63 = vsel %vm2600_vm5, %v2591_v40, %v2593_v41 }
 0x162   : > { %v2609_v1 = vsel %vm388_vm1, %v2601_v63, 0 }
 0x164   : > { %v2595_v44 = vpop.permute.xlu0 %2594  ;;  %v2597_v45 = vpop.permute.xlu1 %2596 }
 0x165   : > { %v2602_v14 = vsel %vm2600_vm5, %v2593_v41, %v2595_v44  ;;  %v2603_v4 = vsel %vm2600_vm5, %v2595_v44, %v2597_v45  ;;  %v3877_v41 = vld [vmem:[%s4978_s2 + $0x54] sm:$0xf] }
 0x166   : > { %v2615_v7 = vsel %vm388_vm1, %v2603_v4, 0 }
 0x167   : > { %3848 = vmatmul.mubr.msk.bf16.vlgmr.msra.gmra.mrb[0].mxu0 %vm384_vm2, %v3846_v36 }
 0x168   : > { %2265 = vmatpush1.bf16.msra.mxu0 %v2253_v37  ;;  %2296 = vmatprep.mubr.bf16.mxu0 %v4241_v6  ;;  %v2599_v51 = vpop.permute.xlu0 %2598  ;;  %v2709_v52 = vpop.permute.xlu1 %2708 }
 0x169   : > { %3857 = vmatprep.subr.msk.bf16.mxu0 %vm388_vm1, %v2364_v39  ;;  %v2604_v60 = vsel %vm2600_vm5, %v2597_v45, %v2599_v51 }
 0x16b   : > { %3850 = vmatmul.mubr.msk.bf16.vlgmr.msra.gmra.mrb[0].mxu1 %vm384_vm2, %v3846_v36 }
 0x16c   : > { %2306 = vmatpush1.bf16.msra.mxu1 %v2259_v42  ;;  %2337 = vmatprep.mubr.bf16.mxu1 %v4241_v6  ;;  %v2711_v11 = vpop.permute.xlu0 %2710  ;;  %v2713_v55 = vpop.permute.xlu1 %2712 }
 0x16d   : > { %3859 = vmatprep.subr.msk.bf16.mxu1 %vm388_vm1, %v2366_v43  ;;  %v2720_v5 = vsel %vm2718_vm6, %v2711_v11, %v2713_v55  ;;  %v2719_v17 = vsel %vm2718_vm6, %v2709_v52, %v2711_v11  ;;  %v3882_v52 = vld [vmem:[%s4978_s2 + $0x58] sm:$0xf] }
 0x16e   : > { %v2727_v19 = vsel %vm388_vm1, %v2719_v17, 0 }
 0x170   : > { %v2715_v12 = vpop.permute.xlu0 %2714  ;;  %v2717_v59 = vpop.permute.xlu1 %2716 }
 0x171   : > { %v2722_v8 = vsel %vm2718_vm6, %v2715_v12, %v2717_v59  ;;  %v2721_v21 = vsel %vm2718_vm6, %v2713_v55, %v2715_v12  ;;  %v3887_v59 = vld [vmem:[%s4978_s2 + $0x5c] sm:$0xf] }
 0x172   : > { %v2733_v23 = vsel %vm388_vm1, %v2721_v21, 0 }
 0x173   : > { %3853 = vmatmul.mubr.msk.bf16.vlgmr.msra.gmra.mrb[0].mxu0 %vm384_vm2, %v3851_v47 }
 0x174   : > { %2383 = vmatpush1.bf16.msra.mxu0 %v2371_v48  ;;  %2414 = vmatprep.mubr.bf16.mxu0 %v4241_v6  ;;  %v2827_v61 = vpop.permute.xlu0 %2826  ;;  %v2829_v62 = vpop.permute.xlu1 %2828 }
 0x175   : > { %3863 = vmatprep.subr.msk.bf16.mxu0 %vm388_vm1, %v2484_v50  ;;  %v2837_v27 = vsel %vm2836_vm7, %v2827_v61, %v2829_v62 }
 0x176   : > { %v2845_v13 = vsel %vm388_vm1, %v2837_v27, 0 }
 0x177   : > { %3855 = vmatmul.mubr.msk.bf16.vlgmr.msra.gmra.mrb[0].mxu1 %vm384_vm2, %v3851_v47 }
 0x178   : > { %2424 = vmatpush1.bf16.msra.mxu1 %v2377_v53  ;;  %2455 = vmatprep.mubr.bf16.mxu1 %v4241_v6  ;;  %v2831_v2 = vpop.permute.xlu0 %2830  ;;  %v2833_v3 = vpop.permute.xlu1 %2832 }
 0x179   : > { %3865 = vmatprep.subr.msk.bf16.mxu1 %vm388_vm1, %v2486_v54  ;;  %v2838_v22 = vsel %vm2836_vm7, %v2829_v62, %v2831_v2  ;;  %v2839_v32 = vsel %vm2836_vm7, %v2831_v2, %v2833_v3 }
 0x17a   : > { %v2851_v34 = vsel %vm388_vm1, %v2839_v32, 0 }
 0x17c   : > { %v2835_v15 = vpop.permute.xlu0 %2834  ;;  %v2945_v16 = vpop.permute.xlu1 %2944 }
 0x17d   : > { %v2840_v25 = vsel %vm2836_vm7, %v2833_v3, %v2835_v15 }
 0x17f   : > { %3858 = vmatmul.mubr.msk.bf16.vlgmr.msra.gmra.mrb[0].mxu0 %vm384_vm2, %v3856_v57 }
 0x180   : > { %2503 = vmatpush1.bf16.msra.mxu0 %v2491_v9  ;;  %2534 = vmatprep.mubr.bf16.mxu0 %v4241_v6  ;;  %v2947_v18 = vpop.permute.xlu0 %2946  ;;  %v2949_v20 = vpop.permute.xlu1 %2948 }
 0x181   : > { %3868 = vmatprep.subr.msk.bf16.mxu0 %vm388_vm1, %v2602_v14  ;;  %v2956_v33 = vsel %vm2954_vm8, %v2947_v18, %v2949_v20  ;;  %v2955_v38 = vsel %vm2954_vm8, %v2945_v16, %v2947_v18 }
 0x182   : > { %v2963_v42 = vsel %vm388_vm1, %v2955_v38, 0 }
 0x183   : > { %3860 = vmatmul.mubr.msk.bf16.vlgmr.msra.gmra.mrb[0].mxu1 %vm384_vm2, %v3856_v57 }
 0x184   : > { %2544 = vmatpush1.bf16.msra.mxu1 %v2497_v28  ;;  %2575 = vmatprep.mubr.bf16.mxu1 %v4241_v6  ;;  %v2951_v24 = vpop.permute.xlu0 %2950  ;;  %v2953_v26 = vpop.permute.xlu1 %2952 }
 0x185   : > { %3870 = vmatprep.subr.msk.bf16.mxu1 %vm388_vm1, %v2604_v60  ;;  %v2958_v37 = vsel %vm2954_vm8, %v2951_v24, %v2953_v26  ;;  %v2957_v43 = vsel %vm2954_vm8, %v2949_v20, %v2951_v24  ;;  %v3897_v20 = vld [vmem:[%s4978_s2 + $0x64] sm:$0xf]  ;;  %v3902_v24 = vld [vmem:[%s4978_s2 + $0x68] sm:$0xf] }
 0x186   : > { %v2969_v46 = vsel %vm388_vm1, %v2957_v43, 0 }
 0x188   : > { %v3063_v29 = vpop.permute.xlu0 %3062  ;;  %v3065_v30 = vpop.permute.xlu1 %3064 }
 0x189   : > { %v3073_v50 = vsel %vm3072_vm9, %v3063_v29, %v3065_v30  ;;  %v3536_v29 = vld [vmem:[%s189_s28] sm:$0xf] }
 0x18a   : > { %v3081_v53 = vsel %vm388_vm1, %v3073_v50, 0 }
 0x18b   : > { %3864 = vmatmul.mubr.msk.bf16.vlgmr.msra.gmra.mrb[0].mxu0 %vm384_vm2, %v3861_v0 }
 0x18c   : > { %2621 = vmatpush1.bf16.msra.mxu0 %v2609_v1  ;;  %2652 = vmatprep.mubr.bf16.mxu0 %v4241_v6  ;;  %v3067_v35 = vpop.permute.xlu0 %3066  ;;  %v3069_v36 = vpop.permute.xlu1 %3068 }
 0x18d   : > { %3873 = vmatprep.subr.msk.bf16.mxu0 %vm388_vm1, %v2720_v5  ;;  %v3074_v44 = vsel %vm3072_vm9, %v3065_v30, %v3067_v35  ;;  %v3075_v54 = vsel %vm3072_vm9, %v3067_v35, %v3069_v36  ;;  %v3892_v5 = vld [vmem:[%s4978_s2 + $0x60] sm:$0xf] }
 0x18e   : > { %v3087_v57 = vsel %vm388_vm1, %v3075_v54, 0 }
 0x18f   : > { %3866 = vmatmul.mubr.msk.bf16.vlgmr.msra.gmra.mrb[0].mxu1 %vm384_vm2, %v3861_v0 }
 0x190   : > { %2662 = vmatpush1.bf16.msra.mxu1 %v2615_v7  ;;  %2693 = vmatprep.mubr.bf16.mxu1 %v4241_v6  ;;  %v3071_v39 = vpop.permute.xlu0 %3070  ;;  %v3181_v40 = vpop.permute.xlu1 %3180 }
 0x191   : > { %3875 = vmatprep.subr.msk.bf16.mxu1 %vm388_vm1, %v2722_v8  ;;  %v3076_v48 = vsel %vm3072_vm9, %v3069_v36, %v3071_v39 }
 0x194   : > { %v3183_v45 = vpop.permute.xlu0 %3182  ;;  %v3185_v47 = vpop.permute.xlu1 %3184 }
 0x195   : > { %v3192_v11 = vsel %vm3190_vm10, %v3183_v45, %v3185_v47  ;;  %v3191_v14 = vsel %vm3190_vm10, %v3181_v40, %v3183_v45 }
 0x196   : > { %v3199_v28 = vsel %vm388_vm1, %v3191_v14, 0 }
 0x197   : > { %3869 = vmatmul.mubr.msk.bf16.vlgmr.msra.gmra.mrb[0].mxu0 %vm384_vm2, %v3867_v10 }
 0x198   : > { %2739 = vmatpush1.bf16.msra.mxu0 %v2727_v19  ;;  %2770 = vmatprep.mubr.bf16.mxu0 %v4241_v6  ;;  %v3187_v49 = vpop.permute.xlu0 %3186  ;;  %v3189_v51 = vpop.permute.xlu1 %3188 }
 0x199   : > { %3878 = vmatprep.subr.msk.bf16.mxu0 %vm388_vm1, %v2838_v22  ;;  %v3194_v9 = vsel %vm3190_vm10, %v3187_v49, %v3189_v51  ;;  %v3193_v60 = vsel %vm3190_vm10, %v3185_v47, %v3187_v49 }
 0x19a   : > { %v3205_v0 = vsel %vm388_vm1, %v3193_v60, 0 }
 0x19b   : > { %3871 = vmatmul.mubr.msk.bf16.vlgmr.msra.gmra.mrb[0].mxu1 %vm384_vm2, %v3867_v10 }
 0x19c   : > { %2780 = vmatpush1.bf16.msra.mxu1 %v2733_v23  ;;  %2811 = vmatprep.mubr.bf16.mxu1 %v4241_v6  ;;  %v3299_v55 = vpop.permute.xlu0 %3298  ;;  %v3301_v56 = vpop.permute.xlu1 %3300 }
 0x19d   : > { %3880 = vmatprep.subr.msk.bf16.mxu1 %vm388_vm1, %v2840_v25  ;;  %v3309_v4 = vsel %vm3308_vm11, %v3299_v55, %v3301_v56  ;;  %v3538_v25 = vlaneseq }
 0x19e   : > { %v3317_v7 = vsel %vm388_vm1, %v3309_v4, 0 }
 0x19f   : > { %v3539_v26 = vshrl.u32 %v3538_v25, 7 }
 0x1a0   : > { %v3303_v12 = vpop.permute.xlu0 %3302  ;;  %v3305_v58 = vpop.permute.xlu1 %3304 }
 0x1a1   : > { %v3310_v61 = vsel %vm3308_vm11, %v3301_v56, %v3303_v12  ;;  %v3311_v8 = vsel %vm3308_vm11, %v3303_v12, %v3305_v58  ;;  %v3540_v27 = vsub.s32 0, %v3539_v26  ;;  %v3544_v30 = vsub.s32 1, %v3539_v26 }
 0x1a2   : > { %v3323_v18 = vsel %vm388_vm1, %v3311_v8, 0  ;;  %v3552_v32 = vsub.s32 3, %v3539_v26 }
 0x1a3   : > { %3874 = vmatmul.mubr.msk.bf16.vlgmr.msra.gmra.mrb[0].mxu0 %vm384_vm2, %v3872_v31 }
 0x1a4   : > { %2857 = vmatpush1.bf16.msra.mxu0 %v2845_v13  ;;  %2888 = vmatprep.mubr.bf16.mxu0 %v4241_v6  ;;  %v3307_v62 = vpop.permute.xlu0 %3306  ;;  %v3417_v63 = vpop.permute.xlu1 %3416  ;;  %v3545_v13 = vrot.slane %v3536_v29, %v3544_v30  ;;  %v3553_v39 = vrot.slane %v3536_v29, %v3552_v32 }
 0x1a5   : > { %3883 = vmatprep.subr.msk.bf16.mxu0 %vm388_vm1, %v2956_v33  ;;  %v3312_v1 = vsel %vm3308_vm11, %v3305_v58, %v3307_v62 }
 0x1a7   : > { %3876 = vmatmul.mubr.msk.bf16.vlgmr.msra.gmra.mrb[0].mxu1 %vm384_vm2, %v3872_v31  ;;  %v3541_v31 = vrot.slane %v3536_v29, %v3540_v27 }
 0x1a8   : > { %2898 = vmatpush1.bf16.msra.mxu1 %v2851_v34  ;;  %2929 = vmatprep.mubr.bf16.mxu1 %v4241_v6  ;;  %v3419_v2 = vpop.permute.xlu0 %3418  ;;  %v3421_v3 = vpop.permute.xlu1 %3420 }
 0x1a9   : > { %3885 = vmatprep.subr.msk.bf16.mxu1 %vm388_vm1, %v2958_v37  ;;  %v3428_v15 = vsel %vm3426_vm12, %v3419_v2, %v3421_v3  ;;  %v3427_v19 = vsel %vm3426_vm12, %v3417_v63, %v3419_v2 }
 0x1aa   : > { %v3435_v21 = vsel %vm388_vm1, %v3427_v19, 0 }
 0x1ac   : > { %v3423_v16 = vpop.permute.xlu0 %3422  ;;  %v3425_v17 = vpop.permute.xlu1 %3424 }
 0x1ad   : > { %v3430_v10 = vsel %vm3426_vm12, %v3423_v16, %v3425_v17  ;;  %v3429_v22 = vsel %vm3426_vm12, %v3421_v3, %v3423_v16 }
 0x1ae   : > { %v3441_v23 = vsel %vm388_vm1, %v3429_v22, 0 }
 0x1af   : > { %3879 = vmatmul.mubr.msk.bf16.vlgmr.msra.gmra.mrb[0].mxu0 %vm384_vm2, %v3877_v41 }
 0x1b0   : > { %2975 = vmatpush1.bf16.msra.mxu0 %v2963_v42  ;;  %3006 = vmatprep.mubr.bf16.mxu0 %v4241_v6 }
 0x1b1   : > { %3888 = vmatprep.subr.msk.bf16.mxu0 %vm388_vm1, %v3074_v44 }
 0x1b3   : > { %3881 = vmatmul.mubr.msk.bf16.vlgmr.msra.gmra.mrb[0].mxu1 %vm384_vm2, %v3877_v41 }
 0x1b4   : > { %3016 = vmatpush1.bf16.msra.mxu1 %v2969_v46  ;;  %3047 = vmatprep.mubr.bf16.mxu1 %v4241_v6 }
 0x1b5   : > { %3890 = vmatprep.subr.msk.bf16.mxu1 %vm388_vm1, %v3076_v48 }
 0x1bb   : > { %3884 = vmatmul.mubr.msk.bf16.vlgmr.msra.gmra.mrb[0].mxu0 %vm384_vm2, %v3882_v52 }
 0x1bc   : > { %3093 = vmatpush1.bf16.msra.mxu0 %v3081_v53  ;;  %3124 = vmatprep.mubr.bf16.mxu0 %v4241_v6 }
 0x1bd   : > { %3893 = vmatprep.subr.msk.bf16.mxu0 %vm388_vm1, %v3192_v11 }
 0x1bf   : > { %3886 = vmatmul.mubr.msk.bf16.vlgmr.msra.gmra.mrb[0].mxu1 %vm384_vm2, %v3882_v52 }
 0x1c0   : > { %3134 = vmatpush1.bf16.msra.mxu1 %v3087_v57  ;;  %3165 = vmatprep.mubr.bf16.mxu1 %v4241_v6 }
 0x1c1   : > { %3895 = vmatprep.subr.msk.bf16.mxu1 %vm388_vm1, %v3194_v9  ;;  %v4268_v9 = vmov (!%p3758_p9), 0.0  }
 0x1c7   : > { %3889 = vmatmul.mubr.msk.bf16.vlgmr.msra.gmra.mrb[0].mxu0 %vm384_vm2, %v3887_v59 }
 0x1c8   : > { %3211 = vmatpush1.bf16.msra.mxu0 %v3199_v28  ;;  %3242 = vmatprep.mubr.bf16.mxu0 %v4241_v6 }
 0x1c9   : > { %3898 = vmatprep.subr.msk.bf16.mxu0 %vm388_vm1, %v3310_v61 }
 0x1cb   : > { %3891 = vmatmul.mubr.msk.bf16.vlgmr.msra.gmra.mrb[0].mxu1 %vm384_vm2, %v3887_v59 }
 0x1cc   : > { %3252 = vmatpush1.bf16.msra.mxu1 %v3205_v0  ;;  %3283 = vmatprep.mubr.bf16.mxu1 %v4241_v6 }
 0x1cd   : > { %3900 = vmatprep.subr.msk.bf16.mxu1 %vm388_vm1, %v3312_v1 }
 0x1d3   : > { %3894 = vmatmul.mubr.msk.bf16.vlgmr.msra.gmra.mrb[0].mxu0 %vm384_vm2, %v3892_v5 }
 0x1d4   : > { %3329 = vmatpush1.bf16.msra.mxu0 %v3317_v7  ;;  %3360 = vmatprep.mubr.bf16.mxu0 %v4241_v6 }
 0x1d5   : > { %3903 = vmatprep.subr.msk.bf16.mxu0 %vm388_vm1, %v3428_v15 }
 0x1d7   : > { %3896 = vmatmul.mubr.msk.bf16.vlgmr.msra.gmra.mrb[0].mxu1 %vm384_vm2, %v3892_v5 }
 0x1d8   : > { %3370 = vmatpush1.bf16.msra.mxu1 %v3323_v18  ;;  %3401 = vmatprep.mubr.bf16.mxu1 %v4241_v6 }
 0x1d9   : > { %3905 = vmatprep.subr.msk.bf16.mxu1 %vm388_vm1, %v3430_v10  ;;  %vm3579_vm1 = vcmask (!%p3758_p9), 15360  }
 0x1da   : > { %3580 = vst.msk [vmem:[%s4343_s7] sm:$0xff] (!%p3758_p9), %vm3579_vm1, %v4268_v9 }
 0x1df   : > { %3899 = vmatmul.mubr.msk.bf16.vlgmr.msra.gmra.mrb[0].mxu0 %vm384_vm2, %v3897_v20 }
 0x1e0   : > { %3447 = vmatpush1.bf16.msra.mxu0 %v3435_v21  ;;  %3478 = vmatprep.mubr.bf16.mxu0 %v4241_v6 }
 0x1e3   : > { %3901 = vmatmul.mubr.msk.bf16.vlgmr.msra.gmra.mrb[0].mxu1 %vm384_vm2, %v3897_v20 }
 0x1e4   : > { %3488 = vmatpush1.bf16.msra.mxu1 %v3441_v23  ;;  %3519 = vmatprep.mubr.bf16.mxu1 %v4241_v6  ;;  %v3548_v6 = vsub.s32 2, %v3539_v26 }
 0x1e6   : > { %v3549_v36 = vrot.slane %v3536_v29, %v3548_v6 }
 0x1eb   : > { %3904 = vmatmul.mubr.msk.bf16.vlgmr.msra.gmra.mrb[0].mxu0 %vm384_vm2, %v3902_v24 }
 0x1ef   : > { %3906 = vmatmul.mubr.msk.bf16.vlgmr.msra.gmra.mrb[0].mxu1 %vm384_vm2, %v3902_v24 }
 0x2be   : > { %v3480_v33 = vpop.f32.mrb[0].mxu0 }
 0x2bf   : > { %3532 = vst [vmem:[%s4348_s10] sm:$0xff] %v3480_v33  ;;  %v3558_v34 = vmul.f32 %v3541_v31, %v3480_v33  ;;  %v3482_v35 = vpop.f32.mrb[1].mxu0 }
 0x2c0   : > { %3533 = vst [vmem:[%s4348_s10 + $0x8] sm:$0xff] %v3482_v35  ;;  %v3559_v37 = vmul.f32 %v3545_v13, %v3482_v35  ;;  %v3484_v38 = vpop.f32.mrb[2].mxu0 }
 0x2c1   : > { %v3567_v40 = vmul.f32 %v3558_v34, %v3480_v33  ;;  %v3485_v41 = vpop.f32.mrb[3].mxu0 }
 0x2c2   : > { %v3562_v42 = vadd.f32 %v3559_v37, %v3558_v34  ;;  %v3568_v43 = vmul.f32 %v3559_v37, %v3482_v35  ;;  %v3521_v44 = vpop.f32.mrb[0].mxu1 }
 0x2c3   : > { %3534 = vst [vmem:[%s4348_s10 + $0x10] sm:$0xff] %v3521_v44  ;;  %v3560_v45 = vmul.f32 %v3549_v36, %v3521_v44  ;;  %v3523_v46 = vpop.f32.mrb[1].mxu1 }
 0x2c4   : > { %v3571_v47 = vadd.f32 %v3568_v43, %v3567_v40  ;;  %3535 = vst [vmem:[%s4348_s10 + $0x18] sm:$0xff] %v3523_v46  ;;  %v3561_v48 = vmul.f32 %v3553_v39, %v3523_v46  ;;  %v3525_v49 = vpop.f32.mrb[2].mxu1 }
 0x2c5   : > { %v3563_v50 = vadd.f32 %v3562_v42, %v3560_v45  ;;  %v3569_v51 = vmul.f32 %v3560_v45, %v3521_v44  ;;  %v3526_v52 = vpop.f32.mrb[3].mxu1 }
 0x2c6   : > { %v3570_v53 = vmul.f32 %v3561_v48, %v3523_v46 }
 0x2c7   : > { %v3572_v54 = vadd.f32 %v3571_v47, %v3569_v51  ;;  %v3564_v11 = vadd.f32 %v3563_v50, %v3561_v48 }
 0x2c9   : > { %3565 = vadd.xlane.f32.xlu0 %v3564_v11  ;;  %v3573_v55 = vadd.f32 %v3572_v54, %v3570_v53 }
 0x2cb   : > { %3574 = vadd.xlane.f32.xlu1 %v3573_v55 }
 0x352   : > { %3578 = sbr.rel (%p3758_p9) target bundleno = 857 (0x359), region = 108 }
 0x356   : > { %v3566_v56 = vpop.xlane.xlu0 %3565 }
 0x358   : > { %v3575_v57 = vpop.xlane.xlu1 %3574 }
 0x359 PF: > { %v3581_v12 = vld [vmem:[%s4343_s7] sm:$0xff]  ;;  %vm3582_vm2 = vcmask 7168   ;;  %vm3585_vm13 = vcmask 15360  }
 0x35a   : > { %v3583_v58 = vsel %vm3582_vm2, %v3566_v56, %v3575_v57 }
 0x35b   : > { %v3584_v14 = vadd.f32 %v3583_v58, %v3581_v12 }
 0x35d   : > { %3586 = vst.msk [vmem:[%s4343_s7] sm:$0xff] %vm3585_vm13, %v3584_v14 }
 0x35e PF: > { %s15_s19 = sadd.s32 1, %s4239_s19   ;;  %s4981_s15 = smov %s4231_s17 }
 0x35f   : > { %p12_p11 = scmp.ge.s32.totalorder %s15_s19, 6   ;;  %s4982_s16 = smov %s4235_s18 }
 0x360   : > { %s4983_s17 = smov %s4986_s20  ;;  %s4984_s18 = smov %s4990_s21 }
 0x361   :  { %14 = sbr.rel (!%p12_p11) target bundleno = 3 (0x3), region = 201 }
 0x368   :  { %3631 = vsyncmov [#allocation3] }
 0x36b   :  { %s3632_s22 = vpop.sfrf %3631 }
 0x36c   :  { %p3910_p12 = scmp.ne.s32.totalorder %s3632_s22, 0 }
 0x36e   :  { %3636 = shalt.err (%p3910_p12)  }
 0x36f   :  { %3638 = vsyncmov [#allocation3 + $0x1] }
 0x372   :  { %s3639_s28 = vpop.sfrf %3638 }
 0x373   :  { %p3911_p13 = scmp.ne.s32.totalorder %s3639_s28, 0 }
 0x375   :  { %3643 = shalt.err (%p3911_p13)  }

// kernel: _lambda_.7
= control target key start
LH: loop header
LB: loop body
LE: loop exit
PB: predicated region body
PF: predicated region fallthrough
CT: control target
= control target key end

     0   :  { %s657_s15 = smov 0   ;;  %s659_s16 = smov 0   ;;  %s728_s0 = inlined_call_operand.vmem [shape: f32[2,8,1024], index: 0, kind: input, shape index: {}]   ;;  %s729_s1 = inlined_call_operand.vmem [shape: f32[2,8,1], index: 1, kind: input, shape index: {}]   ;;  %s730_s2 = inlined_call_operand.vmem [shape: f32[2,8,1], index: 2, kind: input, shape index: {}]   ;;  %s731_s3 = inlined_call_operand.vmem [shape: f32[1,1024], index: 3, kind: input, shape index: {}]   ;;  %s732_s4 = inlined_call_operand.vmem [shape: bf16[2,8,1024], index: 4, kind: output, shape index: {}]  }
   0x1   :  { %s661_s17 = smov 0   ;;  %s663_s18 = smov 0  }
   0x2   :  { %s665_s19 = smov 0  }
   0x3 LB: > { %s23_s20 = sadd.s32 1, %s621_s17  ;;  %s26_s21 = sadd.s32 1, %s625_s18  ;;  %s629_s19 = sphi %s665_s19, %s14_s19   ;;  %s625_s18 = sphi %s663_s18, %s736_s18   ;;  %s621_s17 = sphi %s661_s17, %s735_s17   ;;  %s617_s16 = sphi %s659_s16, %s734_s16   ;;  %s613_s15 = sphi %s657_s15, %s733_s15  }
   0x4   : > { %p24_p0 = scmp.ge.s32.totalorder %s23_s20, 2  ;;  %p513_p1 = scmp.ge.s32.totalorder %s629_s19, 1 }
   0x5   : > { %p211_p2 = scmp.lt.s32.totalorder %s629_s19, 5 }
   0x6   : > { %s738_s20 = smov (%p24_p0, %s23_s20), 0  ;;  %s740_s21 = smov (!%p24_p0, %s26_s21), %s625_s18 }
   0x7   : > { %p212_p3 = pnand %p513_p1, %p211_p2  ;;  %p28_p4 = scmp.ge.s32.totalorder %s740_s21, 2 }
   0x8   : > { %p258_p5 = scmp.lt.s32.totalorder (!%p212_p3), %s617_s16, 1  ;;  %v631_v0 = vmov (!%p212_p3), 0   ;;  %s514_s29 = sshll.u32 (!%p212_p3), %s613_s15, 2  ;;  %v344_v22 = vlaneseq (!%p212_p3) }
   0x9   : > { %s742_s21 = smov (%p28_p4, %s740_s21), 0  ;;  %215 = sbr.rel (%p212_p3) target bundleno = 190 (0xbe), region = 36 }
   0xa   : > { %574 = vset.pattern.permute.xlu0 (!%p212_p3), %v631_v0  ;;  %p260_p6 = scmp.lt.s32.totalorder (!%p212_p3), %s514_s29, 7  ;;  %v345_v29 = vshrl.u32 (!%p212_p3), %v344_v22, 7 }
   0xc   : > { %v346_v31 = vsub.s32 (!%p212_p3), 0, %v345_v29  ;;  %v350_v33 = vsub.s32 (!%p212_p3), 1, %v345_v29  ;;  %v354_v34 = vsub.s32 (!%p212_p3), 2, %v345_v29  ;;  %v358_v35 = vsub.s32 (!%p212_p3), 3, %v345_v29 }
  0x10   : > { %s744_s16 = smov (!%p258_p5, %s617_s16), 1  ;;  %s746_s29 = smov (!%p260_p6, %s514_s29), 7 }
  0x11   : > { %s515_s22 = sshll.u32 %s744_s16, 3  ;;  %s278_s11 = scalar_lea.vmem %s731_s3, %s746_s29 }
  0x12   : > { %s270_s25 = scalar_lea.vmem %s729_s1, %s515_s22  ;;  %s274_s28 = scalar_lea.vmem %s730_s2, %s515_s22  ;;  %v342_v32 = vld [vmem:[%s278_s11] sm:$0xf] }
  0x13   : > { %v294_v1 = vld [vmem:[%s270_s25] sm:$0xff]  ;;  %s699_s30 = sadd.s32 %s515_s22, %s746_s29  ;;  %v347_v36 = vrot.slane %v342_v32, %v346_v31  ;;  %v351_v38 = vrot.slane %v342_v32, %v350_v33  ;;  %v355_v41 = vrot.slane %v342_v32, %v354_v34  ;;  %v359_v44 = vrot.slane %v342_v32, %v358_v35 }
  0x14   : > { %297 = vperm.xlu0 %574, %v294_v1   ;;  %v304_v2 = vld [vmem:[%s274_s28] sm:$0xff]  ;;  %s516_s5 = sshll.u32 %s699_s30, 3  ;;  %s522_s12 = sshll.u32 %s699_s30, 2 }
  0x15   : > { %s265_s8 = scalar_lea.vmem %s728_s0, %s516_s5  ;;  %s288_s15 = scalar_lea.vmem %s732_s4, %s522_s12 }
  0x16   : > { %v290_v3 = vld [vmem:[%s265_s8] sm:$0xff]  ;;  %v291_v5 = vld [vmem:[%s265_s8 + $0x8] sm:$0xff]  ;;  %v292_v6 = vld [vmem:[%s265_s8 + $0x10] sm:$0xff] }
  0x17   : > { %v293_v7 = vld [vmem:[%s265_s8 + $0x18] sm:$0xff] }
  0x18   : > { %307 = vperm.xlu0 %574, %v304_v2  }
  0x93   : > { %v298_v4 = vpop.permute.xlu0 %297 }
  0x94   : > { %v300_v8 = vsub.f32 %v290_v3, %v298_v4  ;;  %v301_v9 = vsub.f32 %v291_v5, %v298_v4  ;;  %v302_v10 = vsub.f32 %v292_v6, %v298_v4  ;;  %v303_v11 = vsub.f32 %v293_v7, %v298_v4 }
  0x97   : > { %v308_v12 = vpop.permute.xlu0 %307 }
  0x98   : > { %v310_v13 = vmul.f32 %v308_v12, %v300_v8  ;;  %v311_v14 = vmul.f32 %v308_v12, %v301_v9  ;;  %v312_v15 = vmul.f32 %v308_v12, %v302_v10  ;;  %v313_v16 = vmul.f32 %v308_v12, %v303_v11 }
  0x9a   : > { %v523_v17 = vmul.f32 -1.442695, %v310_v13  ;;  %v524_v18 = vmul.f32 -1.442695, %v311_v14  ;;  %v525_v19 = vmul.f32 -1.442695, %v312_v15 }
  0x9b   : > { %v526_v20 = vmul.f32 -1.442695, %v313_v16 }
  0x9c   : > { %575 = vpow2.f32 %v523_v17 }
  0x9d   : > { %577 = vpow2.f32 %v524_v18 }
  0x9e   : > { %579 = vpow2.f32 %v525_v19 }
  0x9f   : > { %581 = vpow2.f32 %v526_v20 }
  0xa6   : > { %v576_v21 = vpop.eup %575 }
  0xa7   : > { %v578_v23 = vpop.eup %577  ;;  %v326_v24 = vadd.f32 1.0, %v576_v21 }
  0xa8   : > { %v580_v25 = vpop.eup %579  ;;  %v327_v26 = vadd.f32 1.0, %v578_v23 }
  0xa9   : > { %v582_v27 = vpop.eup %581  ;;  %v328_v28 = vadd.f32 1.0, %v580_v25  ;;  %583 = vrcp.f32 %v326_v24 }
  0xaa   : > { %v329_v30 = vadd.f32 1.0, %v582_v27  ;;  %585 = vrcp.f32 %v327_v26 }
  0xab   : > { %587 = vrcp.f32 %v328_v28 }
  0xac   : > { %589 = vrcp.f32 %v329_v30 }
  0xb3   : > { %v584_v37 = vpop.eup %583 }
  0xb4   : > { %v586_v39 = vpop.eup %585  ;;  %v338_v40 = vmul.f32 %v584_v37, %v310_v13 }
  0xb5   : > { %v588_v42 = vpop.eup %587  ;;  %v339_v43 = vmul.f32 %v586_v39, %v311_v14 }
  0xb6   : > { %v590_v45 = vpop.eup %589  ;;  %v340_v46 = vmul.f32 %v588_v42, %v312_v15  ;;  %v364_v47 = vmul.f32 %v347_v36, %v338_v40 }
  0xb7   : > { %v341_v48 = vmul.f32 %v590_v45, %v313_v16  ;;  %v365_v49 = vmul.f32 %v351_v38, %v339_v43 }
  0xb8   : > { %v366_v50 = vmul.f32 %v355_v41, %v340_v46 }
  0xb9   : > { %v367_v51 = vmul.f32 %v359_v44, %v341_v48  ;;  %v531_v52 = vpack.c.bf16 %v365_v49, %v364_v47 }
  0xbb   : > { %v532_v53 = vpack.c.bf16 %v367_v51, %v366_v50  ;;  %384 = vst [vmem:[%s288_s15] sm:$0xff] %v531_v52 }
  0xbd   : > { %385 = vst [vmem:[%s288_s15 + $0x8] sm:$0xff] %v532_v53 }
  0xbe PF: > { %s14_s19 = sadd.s32 1, %s629_s19   ;;  %s733_s15 = smov %s621_s17 }
  0xbf   : > { %p11_p7 = scmp.ge.s32.totalorder %s14_s19, 6   ;;  %s734_s16 = smov %s625_s18 }
  0xc0   : > { %s735_s17 = smov %s738_s20  ;;  %s736_s18 = smov %s742_s21 }
  0xc1   :  { %13 = sbr.rel (!%p11_p7) target bundleno = 3 (0x3), region = 75 }

</bundles_post_ra>
